<compile_context>
chip_gen: v5e
topology: v5e:2x2
jax: 0.10.0
libtpu: 0.0.40
codegen_flags: <defaults>
</compile_context>

<pallas_src>
import functools

import jax
import jax.numpy as jnp
from jax.experimental import pallas as pl
from jax.experimental.pallas import tpu as pltpu


_LANE = 128
_VMEM_BUDGET_BYTES = 20 * (1 << 20)  # working-set target: headroom on v7x's 32 MiB scoped VMEM


def _round_up(x, m):
    return (x + m - 1) // m * m


def _ffn_kernel(n_linear, x_ref, *refs):
    """Fused MLP on one (tile_m, K0) row tile.

    refs = (w0, b0, w1, b1, ..., out_ref): n_linear Linear layers, the first
    n_linear - 1 followed by tanh, matching
    nn.Sequential(Linear, Tanh, ..., Linear, Tanh, Linear).
    All feature dims are pre-padded to multiples of 128 (lane-dense).
    """
    out_ref = refs[-1]
    param_refs = refs[:-1]

    h = x_ref[...]
    for li in range(n_linear):
        w = param_refs[2 * li][...]        # (din_p, H) in compute dtype
        b = param_refs[2 * li + 1][...]    # (1, H)
        # .astype is a no-op in the all-f32 path; when compute_dtype=bf16 it is
        # the single down-cast feeding the MXU, with f32 accumulation.
        h = jnp.dot(h.astype(w.dtype), w, preferred_element_type=jnp.float32)
        h = h + b.astype(jnp.float32)
        if li < n_linear - 1:
            h = jnp.tanh(h)
    out_ref[...] = h.astype(out_ref.dtype)


def feed_forward_tts_forward(inputs, input_lengths, teacher, params, *,
                             ratio, tf_rate=0.0, tile_m=512,
                             compute_dtype=jnp.float32):
    """Pallas implementation of FeedForwardTTS.forward.

    inputs:  (B, T, input_dim)
    params:  list of (weight (in_features, out_features), bias (out_features,))
             per Linear layer (weights transposed vs. PyTorch storage; same math).
    returns: (outputs, None, None) with outputs (B, T*ratio, hidden_dim//ratio).
    """
    del input_lengths, teacher, tf_rate  # unused by the PyTorch forward as well

    B, T, input_dim = inputs.shape
    hidden_dim = params[-1][0].shape[1]
    n_linear = len(params)
    out_dtype = inputs.dtype
    out_itemsize = jnp.dtype(out_dtype).itemsize
    act_itemsize = jnp.dtype(compute_dtype).itemsize

    # ---- lane-dense zero padding of feature dims (mathematically exact) ----
    K0 = _round_up(input_dim, _LANE)
    H = _round_up(hidden_dim, _LANE)

    flat_params = []
    param_bytes = 0
    for li, (w, b) in enumerate(params):
        din_p = K0 if li == 0 else H
        wp = jnp.pad(w, ((0, din_p - w.shape[0]), (0, H - w.shape[1])))
        bp = jnp.pad(b, (0, H - b.shape[0])).reshape(1, H)
        wp = wp.astype(compute_dtype)        # cast once here, not per grid step
        bp = bp.astype(compute_dtype)
        flat_params += [wp, bp]
        param_bytes += wp.size * wp.dtype.itemsize + bp.size * bp.dtype.itemsize

    # ---- row tiling: large MXU-friendly tiles, VMEM-budgeted, megacore-aware
    M = B * T
    m128 = _round_up(M, _LANE)
    tile = max(_LANE, min(_round_up(tile_m, _LANE), m128))
    if m128 // tile < 2 and m128 >= 2 * _LANE:
        # v7x has 2 TensorCores: keep >= 2 steps on the "parallel" grid axis.
        tile = _round_up(m128 // 2, _LANE)

    def working_set_bytes(t):
        # 2x-buffered in/out row tiles + live f32 activations + weights
        # (weights counted double-buffered to stay conservative).
        return (2 * t * K0 * act_itemsize + 2 * t * H * out_itemsize
                + t * H * 4 + 2 * param_bytes)

    while tile > _LANE and working_set_bytes(tile) > _VMEM_BUDGET_BYTES:
        tile -= _LANE

    M_pad = _round_up(M, tile)
    grid_m = M_pad // tile

    x2d = inputs.reshape(M, input_dim).astype(compute_dtype)
    x2d = jnp.pad(x2d, ((0, M_pad - M), (0, K0 - input_dim)))

    # ---- scheduler / compiler hints ----------------------------------------
    flops = 2 * M_pad * sum(int(w.shape[0]) * int(w.shape[1])
                            for w in flat_params[0::2])
    cost = pl.CostEstimate(
        flops=flops,
        transcendentals=M_pad * H * (n_linear - 1),
        bytes_accessed=M_pad * K0 * act_itemsize + M_pad * H * out_itemsize
                       + param_bytes)
    vmem_limit = int(min(56 << 20, max(32 << 20, 2 * working_set_bytes(tile))))
    compiler_params = pltpu.CompilerParams(
        dimension_semantics=("parallel",),
        vmem_limit_bytes=vmem_limit)

    x_spec = pl.BlockSpec((tile, K0), lambda i: (i, 0))
    out_spec = pl.BlockSpec((tile, H), lambda i: (i, 0))

    def call(weight_pipeline_mode):
        w_specs = []
        for p in flat_params:
            if weight_pipeline_mode is None:
                w_specs.append(pl.BlockSpec(p.shape, lambda i: (0, 0)))
            else:
                w_specs.append(pl.BlockSpec(p.shape, lambda i: (0, 0),
                                            pipeline_mode=weight_pipeline_mode))
        return pl.pallas_call(
            functools.partial(_ffn_kernel, n_linear),
            out_shape=jax.ShapeDtypeStruct((M_pad, H), out_dtype),
            grid_spec=pltpu.PrefetchScalarGridSpec(
                num_scalar_prefetch=0,
                grid=(grid_m,),
                in_specs=[x_spec] + w_specs,
                out_specs=out_spec),
            compiler_params=compiler_params,
            cost_estimate=cost,
        )(x2d, *flat_params)

    try:
        # Constant-index weight/bias blocks only need a single VMEM buffer.
        out2d = call(pl.Buffered(1))
    except Exception:  # pragma: no cover — per-spec buffering unsupported here
        out2d = call(None)

    outputs = out2d[:M, :hidden_dim].reshape(B, T, hidden_dim)
    # outputs.reshape(-1, T * ratio, hidden_dim // ratio)
    outputs = outputs.reshape(-1, T * ratio, hidden_dim // ratio)
    return outputs, None, None


def make_params(key, input_dim, mel_dim, num_layers, ratio):
    """Synthetic parameters matching the module's construction.

    Note: the PyTorch Sequential uses `(num_layers - 1) * [Linear, Tanh]`,
    which repeats the SAME Linear instance — i.e. the middle hidden layers
    share weights.  Reproduced here by repeating one (w, b) pair.
    Weights are (in_features, out_features) = transpose of PyTorch storage
    (identical math: y = x @ W + b).
    """
    hidden_dim = mel_dim * ratio

    def linear(k, din, dout):
        kw, kb = jax.random.split(k)
        s = 1.0 / jnp.sqrt(jnp.float32(din))
        w = jax.random.uniform(kw, (din, dout), jnp.float32, -s, s)
        b = jax.random.uniform(kb, (dout,), jnp.float32, -s, s)
        return w, b

    k1, k2, k3 = jax.random.split(key, 3)
    first = linear(k1, input_dim, hidden_dim)
    shared_mid = linear(k2, hidden_dim, hidden_dim)
    last = linear(k3, hidden_dim, hidden_dim)
    return [first] + [shared_mid] * (num_layers - 1) + [last]


def _reference(inputs, params, ratio):
    """Plain-JAX reference (same math as the PyTorch decoder)."""
    B, T, _ = inputs.shape
    hidden_dim = params[-1][0].shape[1]
    h = inputs.reshape(B * T, -1)
    for li, (w, b) in enumerate(params):
        h = h @ w + b
        if li < len(params) - 1:
            h = jnp.tanh(h)
    return h.reshape(-1, T * ratio, hidden_dim // ratio)


if __name__ == "__main__":
    key = jax.random.PRNGKey(0)

    # Case 1: small, module-consistent shapes.
    B, T, input_dim, mel_dim, ratio, num_layers = 2, 8, 32, 16, 2, 2
    hidden_dim = mel_dim * ratio  # 32
    key, kx = jax.random.split(key)
    inputs = jax.random.normal(kx, (B, T, input_dim), jnp.float32)
    input_lengths = jnp.full((B,), T, jnp.int32)               # unused (parity)
    teacher = jnp.zeros((B, T * ratio, mel_dim), jnp.float32)  # unused (parity)
    params = make_params(key, input_dim, mel_dim, num_layers, ratio)

    outputs, _, _ = feed_forward_tts_forward(
        inputs, input_lengths, teacher, params, ratio=ratio)
    outputs = jax.block_until_ready(outputs)
    ref = _reference(inputs, params, ratio)
    assert outputs.shape == (B, T * ratio, hidden_dim // ratio), outputs.shape
    assert jnp.allclose(outputs, ref, atol=1e-4, rtol=1e-4)

    # Case 2: odd sizes exercising row padding and a multi-step (>=2) grid.
    B2, T2, in2, mel2, r2, L2 = 3, 100, 80, 20, 4, 3
    h2 = mel2 * r2  # 80
    key, kx2 = jax.random.split(key)
    inputs2 = jax.random.normal(kx2, (B2, T2, in2), jnp.float32)
    params2 = make_params(key, in2, mel2, L2, r2)
    out2, _, _ = feed_forward_tts_forward(
        inputs2, jnp.full((B2,), T2, jnp.int32),
        jnp.zeros((B2, T2 * r2, mel2), jnp.float32), params2, ratio=r2)
    out2 = jax.block_until_ready(out2)
    ref2 = _reference(inputs2, params2, r2)
    assert out2.shape == (B2, T2 * r2, h2 // r2), out2.shape
    assert jnp.allclose(out2, ref2, atol=1e-4, rtol=1e-4)

    print("KERNEL_OK")
</pallas_src>

<mosaic_0001>
module attributes {stable_mosaic.version = 11 : i64} {
  func.func @_ffn_kernel(%arg0: i32, %arg1: memref<128x128xf32, #tpu.memory_space<vmem>>, %arg2: memref<128x128xf32, #tpu.memory_space<vmem>>, %arg3: memref<1x128xf32, #tpu.memory_space<vmem>>, %arg4: memref<128x128xf32, #tpu.memory_space<vmem>>, %arg5: memref<1x128xf32, #tpu.memory_space<vmem>>, %arg6: memref<128x128xf32, #tpu.memory_space<vmem>>, %arg7: memref<1x128xf32, #tpu.memory_space<vmem>>, %arg8: memref<128x128xf32, #tpu.memory_space<vmem>>) attributes {dimension_semantics = [#tpu.dimension_semantics<parallel>], iteration_bounds = array<i64: 1>, scalar_prefetch = 0 : i64, scratch_operands = 0 : i64, tpu.core_type = #tpu.core_type<tc>, window_params = [{transform_indices = @transform_0, window_bounds = array<i64: 128, 128>}, {pipeline_mode = #tpu.pipeline_mode<synchronous>, transform_indices = @transform_1, window_bounds = array<i64: 128, 128>}, {pipeline_mode = #tpu.pipeline_mode<synchronous>, transform_indices = @transform_2, window_bounds = array<i64: 1, 128>}, {pipeline_mode = #tpu.pipeline_mode<synchronous>, transform_indices = @transform_3, window_bounds = array<i64: 128, 128>}, {pipeline_mode = #tpu.pipeline_mode<synchronous>, transform_indices = @transform_4, window_bounds = array<i64: 1, 128>}, {pipeline_mode = #tpu.pipeline_mode<synchronous>, transform_indices = @transform_5, window_bounds = array<i64: 128, 128>}, {pipeline_mode = #tpu.pipeline_mode<synchronous>, transform_indices = @transform_6, window_bounds = array<i64: 1, 128>}, {transform_indices = @transform_7, window_bounds = array<i64: 128, 128>}]} {
    %c0 = arith.constant 0 : index
    %c0_0 = arith.constant 0 : index
    %0 = vector.load %arg1[%c0, %c0_0] : memref<128x128xf32, #tpu.memory_space<vmem>>, vector<128x128xf32>
    %c0_1 = arith.constant 0 : index
    %c0_2 = arith.constant 0 : index
    %1 = vector.load %arg2[%c0_1, %c0_2] : memref<128x128xf32, #tpu.memory_space<vmem>>, vector<128x128xf32>
    %c0_3 = arith.constant 0 : index
    %c0_4 = arith.constant 0 : index
    %2 = vector.load %arg3[%c0_3, %c0_4] : memref<1x128xf32, #tpu.memory_space<vmem>>, vector<1x128xf32>
    %cst = arith.constant dense<0.000000e+00> : vector<128x128xf32>
    %3 = tpu.matmul %0, %1, %cst {dimension_numbers = #tpu.dot_dimension_numbers<[1], [0], [0], [1], [0, 0, 1, 1], [], []>} : vector<128x128xf32>, vector<128x128xf32>, vector<128x128xf32> -> vector<128x128xf32>
    %4 = vector.broadcast %2 : vector<1x128xf32> to vector<128x128xf32>
    %5 = arith.addf %3, %4 : vector<128x128xf32>
    %6 = math.tanh %5 : vector<128x128xf32>
    %c0_5 = arith.constant 0 : index
    %c0_6 = arith.constant 0 : index
    %7 = vector.load %arg4[%c0_5, %c0_6] : memref<128x128xf32, #tpu.memory_space<vmem>>, vector<128x128xf32>
    %c0_7 = arith.constant 0 : index
    %c0_8 = arith.constant 0 : index
    %8 = vector.load %arg5[%c0_7, %c0_8] : memref<1x128xf32, #tpu.memory_space<vmem>>, vector<1x128xf32>
    %cst_9 = arith.constant dense<0.000000e+00> : vector<128x128xf32>
    %9 = tpu.matmul %6, %7, %cst_9 {dimension_numbers = #tpu.dot_dimension_numbers<[1], [0], [0], [1], [0, 0, 1, 1], [], []>} : vector<128x128xf32>, vector<128x128xf32>, vector<128x128xf32> -> vector<128x128xf32>
    %10 = vector.broadcast %8 : vector<1x128xf32> to vector<128x128xf32>
    %11 = arith.addf %9, %10 : vector<128x128xf32>
    %12 = math.tanh %11 : vector<128x128xf32>
    %c0_10 = arith.constant 0 : index
    %c0_11 = arith.constant 0 : index
    %13 = vector.load %arg6[%c0_10, %c0_11] : memref<128x128xf32, #tpu.memory_space<vmem>>, vector<128x128xf32>
    %c0_12 = arith.constant 0 : index
    %c0_13 = arith.constant 0 : index
    %14 = vector.load %arg7[%c0_12, %c0_13] : memref<1x128xf32, #tpu.memory_space<vmem>>, vector<1x128xf32>
    %cst_14 = arith.constant dense<0.000000e+00> : vector<128x128xf32>
    %15 = tpu.matmul %12, %13, %cst_14 {dimension_numbers = #tpu.dot_dimension_numbers<[1], [0], [0], [1], [0, 0, 1, 1], [], []>} : vector<128x128xf32>, vector<128x128xf32>, vector<128x128xf32> -> vector<128x128xf32>
    %16 = vector.broadcast %14 : vector<1x128xf32> to vector<128x128xf32>
    %17 = arith.addf %15, %16 : vector<128x128xf32>
    %c0_15 = arith.constant 0 : index
    %c0_16 = arith.constant 0 : index
    %18 = vector.load %arg8[%c0_15, %c0_16] : memref<128x128xf32, #tpu.memory_space<vmem>>, vector<128x128xf32>
    tpu.vector_store %arg8[%c0_15, %c0_16], %17 {strides = array<i32>} : memref<128x128xf32, #tpu.memory_space<vmem>>, vector<128x128xf32>,
    return
  }
  func.func @transform_0(%arg0: i32) -> (i32, i32) {
    %c0_i32 = arith.constant 0 : i32
    %c0_i32_0 = arith.constant 0 : i32
    return %arg0, %c0_i32 : i32, i32
  }
  func.func @transform_1(%arg0: i32) -> (i32, i32) {
    %c0_i32 = arith.constant 0 : i32
    %c0_i32_0 = arith.constant 0 : i32
    %c0_i32_1 = arith.constant 0 : i32
    return %c0_i32, %c0_i32_0 : i32, i32
  }
  func.func @transform_2(%arg0: i32) -> (i32, i32) {
    %c0_i32 = arith.constant 0 : i32
    %c0_i32_0 = arith.constant 0 : i32
    %c0_i32_1 = arith.constant 0 : i32
    return %c0_i32, %c0_i32_0 : i32, i32
  }
  func.func @transform_3(%arg0: i32) -> (i32, i32) {
    %c0_i32 = arith.constant 0 : i32
    %c0_i32_0 = arith.constant 0 : i32
    %c0_i32_1 = arith.constant 0 : i32
    return %c0_i32, %c0_i32_0 : i32, i32
  }
  func.func @transform_4(%arg0: i32) -> (i32, i32) {
    %c0_i32 = arith.constant 0 : i32
    %c0_i32_0 = arith.constant 0 : i32
    %c0_i32_1 = arith.constant 0 : i32
    return %c0_i32, %c0_i32_0 : i32, i32
  }
  func.func @transform_5(%arg0: i32) -> (i32, i32) {
    %c0_i32 = arith.constant 0 : i32
    %c0_i32_0 = arith.constant 0 : i32
    %c0_i32_1 = arith.constant 0 : i32
    return %c0_i32, %c0_i32_0 : i32, i32
  }
  func.func @transform_6(%arg0: i32) -> (i32, i32) {
    %c0_i32 = arith.constant 0 : i32
    %c0_i32_0 = arith.constant 0 : i32
    %c0_i32_1 = arith.constant 0 : i32
    return %c0_i32, %c0_i32_0 : i32, i32
  }
  func.func @transform_7(%arg0: i32) -> (i32, i32) {
    %c0_i32 = arith.constant 0 : i32
    %c0_i32_0 = arith.constant 0 : i32
    return %arg0, %c0_i32 : i32, i32
  }
}

module attributes {stable_mosaic.version = 11 : i64} {
  func.func @_ffn_kernel(%arg0: i32, %arg1: memref<128x128xf32, #tpu.memory_space<vmem>>, %arg2: memref<128x128xf32, #tpu.memory_space<vmem>>, %arg3: memref<1x128xf32, #tpu.memory_space<vmem>>, %arg4: memref<128x128xf32, #tpu.memory_space<vmem>>, %arg5: memref<1x128xf32, #tpu.memory_space<vmem>>, %arg6: memref<128x128xf32, #tpu.memory_space<vmem>>, %arg7: memref<1x128xf32, #tpu.memory_space<vmem>>, %arg8: memref<128x128xf32, #tpu.memory_space<vmem>>) attributes {dimension_semantics = [#tpu.dimension_semantics<parallel>], iteration_bounds = array<i64: 1>, scalar_prefetch = 0 : i64, scratch_operands = 0 : i64, tpu.core_type = #tpu.core_type<tc>, window_params = [{transform_indices = @transform_0, window_bounds = array<i64: 128, 128>}, {pipeline_mode = #tpu.pipeline_mode<synchronous>, transform_indices = @transform_1, window_bounds = array<i64: 128, 128>}, {pipeline_mode = #tpu.pipeline_mode<synchronous>, transform_indices = @transform_2, window_bounds = array<i64: 1, 128>}, {pipeline_mode = #tpu.pipeline_mode<synchronous>, transform_indices = @transform_3, window_bounds = array<i64: 128, 128>}, {pipeline_mode = #tpu.pipeline_mode<synchronous>, transform_indices = @transform_4, window_bounds = array<i64: 1, 128>}, {pipeline_mode = #tpu.pipeline_mode<synchronous>, transform_indices = @transform_5, window_bounds = array<i64: 128, 128>}, {pipeline_mode = #tpu.pipeline_mode<synchronous>, transform_indices = @transform_6, window_bounds = array<i64: 1, 128>}, {transform_indices = @transform_7, window_bounds = array<i64: 128, 128>}]} {
    %c0 = arith.constant 0 : index
    %c0_0 = arith.constant 0 : index
    %0 = vector.load %arg1[%c0, %c0_0] : memref<128x128xf32, #tpu.memory_space<vmem>>, vector<128x128xf32>
    %c0_1 = arith.constant 0 : index
    %c0_2 = arith.constant 0 : index
    %1 = vector.load %arg2[%c0_1, %c0_2] : memref<128x128xf32, #tpu.memory_space<vmem>>, vector<128x128xf32>
    %c0_3 = arith.constant 0 : index
    %c0_4 = arith.constant 0 : index
    %2 = vector.load %arg3[%c0_3, %c0_4] : memref<1x128xf32, #tpu.memory_space<vmem>>, vector<1x128xf32>
    %cst = arith.constant dense<0.000000e+00> : vector<128x128xf32>
    %3 = tpu.matmul %0, %1, %cst {dimension_numbers = #tpu.dot_dimension_numbers<[1], [0], [0], [1], [0, 0, 1, 1], [], []>} : vector<128x128xf32>, vector<128x128xf32>, vector<128x128xf32> -> vector<128x128xf32>
    %4 = vector.broadcast %2 : vector<1x128xf32> to vector<128x128xf32>
    %5 = arith.addf %3, %4 : vector<128x128xf32>
    %6 = math.tanh %5 : vector<128x128xf32>
    %c0_5 = arith.constant 0 : index
    %c0_6 = arith.constant 0 : index
    %7 = vector.load %arg4[%c0_5, %c0_6] : memref<128x128xf32, #tpu.memory_space<vmem>>, vector<128x128xf32>
    %c0_7 = arith.constant 0 : index
    %c0_8 = arith.constant 0 : index
    %8 = vector.load %arg5[%c0_7, %c0_8] : memref<1x128xf32, #tpu.memory_space<vmem>>, vector<1x128xf32>
    %cst_9 = arith.constant dense<0.000000e+00> : vector<128x128xf32>
    %9 = tpu.matmul %6, %7, %cst_9 {dimension_numbers = #tpu.dot_dimension_numbers<[1], [0], [0], [1], [0, 0, 1, 1], [], []>} : vector<128x128xf32>, vector<128x128xf32>, vector<128x128xf32> -> vector<128x128xf32>
    %10 = vector.broadcast %8 : vector<1x128xf32> to vector<128x128xf32>
    %11 = arith.addf %9, %10 : vector<128x128xf32>
    %12 = math.tanh %11 : vector<128x128xf32>
    %c0_10 = arith.constant 0 : index
    %c0_11 = arith.constant 0 : index
    %13 = vector.load %arg6[%c0_10, %c0_11] : memref<128x128xf32, #tpu.memory_space<vmem>>, vector<128x128xf32>
    %c0_12 = arith.constant 0 : index
    %c0_13 = arith.constant 0 : index
    %14 = vector.load %arg7[%c0_12, %c0_13] : memref<1x128xf32, #tpu.memory_space<vmem>>, vector<1x128xf32>
    %cst_14 = arith.constant dense<0.000000e+00> : vector<128x128xf32>
    %15 = tpu.matmul %12, %13, %cst_14 {dimension_numbers = #tpu.dot_dimension_numbers<[1], [0], [0], [1], [0, 0, 1, 1], [], []>} : vector<128x128xf32>, vector<128x128xf32>, vector<128x128xf32> -> vector<128x128xf32>
    %16 = vector.broadcast %14 : vector<1x128xf32> to vector<128x128xf32>
    %17 = arith.addf %15, %16 : vector<128x128xf32>
    %c0_15 = arith.constant 0 : index
    %c0_16 = arith.constant 0 : index
    %18 = vector.load %arg8[%c0_15, %c0_16] : memref<128x128xf32, #tpu.memory_space<vmem>>, vector<128x128xf32>
    tpu.vector_store %arg8[%c0_15, %c0_16], %17 {strides = array<i32>} : memref<128x128xf32, #tpu.memory_space<vmem>>, vector<128x128xf32>,
    return
  }
  func.func @transform_0(%arg0: i32) -> (i32, i32) {
    %c0_i32 = arith.constant 0 : i32
    %c0_i32_0 = arith.constant 0 : i32
    return %arg0, %c0_i32 : i32, i32
  }
  func.func @transform_1(%arg0: i32) -> (i32, i32) {
    %c0_i32 = arith.constant 0 : i32
    %c0_i32_0 = arith.constant 0 : i32
    %c0_i32_1 = arith.constant 0 : i32
    return %c0_i32, %c0_i32_0 : i32, i32
  }
  func.func @transform_2(%arg0: i32) -> (i32, i32) {
    %c0_i32 = arith.constant 0 : i32
    %c0_i32_0 = arith.constant 0 : i32
    %c0_i32_1 = arith.constant 0 : i32
    return %c0_i32, %c0_i32_0 : i32, i32
  }
  func.func @transform_3(%arg0: i32) -> (i32, i32) {
    %c0_i32 = arith.constant 0 : i32
    %c0_i32_0 = arith.constant 0 : i32
    %c0_i32_1 = arith.constant 0 : i32
    return %c0_i32, %c0_i32_0 : i32, i32
  }
  func.func @transform_4(%arg0: i32) -> (i32, i32) {
    %c0_i32 = arith.constant 0 : i32
    %c0_i32_0 = arith.constant 0 : i32
    %c0_i32_1 = arith.constant 0 : i32
    return %c0_i32, %c0_i32_0 : i32, i32
  }
  func.func @transform_5(%arg0: i32) -> (i32, i32) {
    %c0_i32 = arith.constant 0 : i32
    %c0_i32_0 = arith.constant 0 : i32
    %c0_i32_1 = arith.constant 0 : i32
    return %c0_i32, %c0_i32_0 : i32, i32
  }
  func.func @transform_6(%arg0: i32) -> (i32, i32) {
    %c0_i32 = arith.constant 0 : i32
    %c0_i32_0 = arith.constant 0 : i32
    %c0_i32_1 = arith.constant 0 : i32
    return %c0_i32, %c0_i32_0 : i32, i32
  }
  func.func @transform_7(%arg0: i32) -> (i32, i32) {
    %c0_i32 = arith.constant 0 : i32
    %c0_i32_0 = arith.constant 0 : i32
    return %arg0, %c0_i32 : i32, i32
  }
}

</mosaic_0001>

<bundles_post_ra>
// kernel: tpu_custom_call.1
= control target key start
LH: loop header
LB: loop body
LE: loop exit
PB: predicated region body
PF: predicated region fallthrough
CT: control target
= control target key end

     0   :  { %12 = vsyncpa [#allocation3], 0  ;;  %s802_s0 = inlined_call_operand.hbm [shape: f32[128,128], index: 0, kind: input, shape index: {}]   ;;  %s803_s1 = inlined_call_operand.hbm [shape: f32[128,128], index: 1, kind: input, shape index: {}]   ;;  %s804_s2 = inlined_call_operand.vmem [shape: f32[1,128], index: 2, kind: input, shape index: {}]   ;;  %s805_s3 = inlined_call_operand.hbm [shape: f32[128,128], index: 3, kind: input, shape index: {}]   ;;  %s806_s4 = inlined_call_operand.vmem [shape: f32[1,128], index: 4, kind: input, shape index: {}]   ;;  %s807_s5 = inlined_call_operand.hbm [shape: f32[128,128], index: 5, kind: input, shape index: {}]   ;;  %s808_s6 = inlined_call_operand.vmem [shape: f32[1,128], index: 6, kind: input, shape index: {}]   ;;  %s809_s7 = inlined_call_operand.hbm [shape: f32[128,128], index: 7, kind: output, shape index: {}]  }
   0x1   :  { %13 = vsyncpa [#allocation6], 0 }
   0x2   :  { %14 = vsyncpa [#allocation9], 0 }
   0x3   :  { %15 = vsyncpa [#allocation4], 0  ;;  %s33_s26 = sshll.u32 %s803_s1, 4  ;;  %s680_s27 = smov [#allocation5]   ;;  %s34_s26 = int_to_ptr.hbm [resolvable:$true] %s33_s26 }
   0x4   :  { %s35_s28 = sshll.u32 %s680_s27, 4  ;;  %s20_s8 = sshll.u32 %s802_s0, 4  ;;  %s36_s28 = int_to_ptr.vmem [resolvable:$true] %s35_s28  ;;  %s21_s8 = int_to_ptr.hbm [resolvable:$true] %s20_s8 }
   0x5   :  { %s681_s9 = smov 128   ;;  %s682_s10 = smov 8  }
   0x6   :  { %41 = dma.hbm_to_vmem [thread:$0]  %s34_s26, 2048, %s36_s28, [#allocation6], %s681_s9, %s681_s9, %s682_s10  }
   0x7   :  { %s683_s11 = smov [#allocation2]   ;;  %s48_s1 = sshll.u32 %s805_s3, 4  ;;  %s49_s1 = int_to_ptr.hbm [resolvable:$true] %s48_s1 }
   0x8   :  { %s22_s12 = sshll.u32 %s683_s11, 4  ;;  %s63_s16 = sshll.u32 %s807_s5, 4  ;;  %s23_s12 = int_to_ptr.vmem [resolvable:$true] %s22_s12  ;;  %s64_s16 = int_to_ptr.hbm [resolvable:$true] %s63_s16 }
   0x9   :  { %28 = dma.hbm_to_vmem [thread:$0]  %s21_s8, 2048, %s23_s12, [#allocation3], %s681_s9, %s681_s9, %s682_s10  }
   0xa   :  { %s684_s17 = smov [#allocation7]   ;;  %s685_s19 = smov [#allocation8]  }
   0xb   :  { %s50_s18 = sshll.u32 %s684_s17, 4  ;;  %s65_s3 = sshll.u32 %s685_s19, 4  ;;  %s51_s18 = int_to_ptr.vmem [resolvable:$true] %s50_s18  ;;  %s66_s3 = int_to_ptr.vmem [resolvable:$true] %s65_s3 }
   0xc   :  { %56 = dma.hbm_to_vmem [thread:$0]  %s49_s1, 2048, %s51_s18, [#allocation6], %s681_s9, %s681_s9, %s682_s10  }
   0xd   :  { %71 = dma.hbm_to_vmem [thread:$0]  %s64_s16, 2048, %s66_s3, [#allocation9], %s681_s9, %s681_s9, %s682_s10  }
   0xe   :  { %672 = dma.done.wait [#allocation3], 2048  }
   0xf   :  { %673 = vsyncadd [#allocation3], 4294965248 }
  0x10   :  { %674 = dma.done.wait [#allocation6], 4096  }
  0x11   :  { %675 = vsyncadd [#allocation6], 4294963200 }
  0x12   :  { %676 = dma.done.wait [#allocation9], 2048  }
  0x13   :  { %677 = vsyncadd [#allocation9], 4294965248  ;;  %v121_v0 = vld [vmem:[#allocation5 + $0x78] sm:$0xff]  ;;  %v120_v1 = vld [vmem:[#allocation5 + $0x70] sm:$0xff]  ;;  %s415_s26 = sshll.u32 %s809_s7, 4  ;;  %s416_s26 = int_to_ptr.hbm [resolvable:$true] %s415_s26 }
  0x14   :  { %126 = vmatpush.msra.mxu0 %v121_v0  ;;  %430 = vmatpush.msra.mxu3 %v121_v0  ;;  %v119_v2 = vld [vmem:[#allocation5 + $0x68] sm:$0xff]  ;;  %v118_v3 = vld [vmem:[#allocation5 + $0x60] sm:$0xff]  ;;  %v117_v4 = vld [vmem:[#allocation5 + $0x58] sm:$0xff] }
  0x15   :  { %v116_v5 = vld [vmem:[#allocation5 + $0x50] sm:$0xff]  ;;  %v115_v6 = vld [vmem:[#allocation5 + $0x48] sm:$0xff]  ;;  %v114_v7 = vld [vmem:[#allocation5 + $0x40] sm:$0xff] }
  0x16   :  { %127 = vmatpush.msra.mxu0 %v120_v1  ;;  %431 = vmatpush.msra.mxu3 %v120_v1  ;;  %v113_v8 = vld [vmem:[#allocation5 + $0x38] sm:$0xff]  ;;  %v112_v9 = vld [vmem:[#allocation5 + $0x30] sm:$0xff]  ;;  %v111_v10 = vld [vmem:[#allocation5 + $0x28] sm:$0xff] }
  0x17   :  { %v110_v11 = vld [vmem:[#allocation5 + $0x20] sm:$0xff]  ;;  %v109_v12 = vld [vmem:[#allocation5 + $0x18] sm:$0xff]  ;;  %v108_v13 = vld [vmem:[#allocation5 + $0x10] sm:$0xff] }
  0x18   :  { %128 = vmatpush.msra.mxu0 %v119_v2  ;;  %432 = vmatpush.msra.mxu3 %v119_v2  ;;  %v107_v14 = vld [vmem:[#allocation5 + $0x8] sm:$0xff]  ;;  %v106_v15 = vld [vmem:[#allocation5] sm:$0xff]  ;;  %v92_v18 = vld [vmem:[#allocation2 + $0x10] sm:$0xff] }
  0x19   :  { %v90_v16 = vld [vmem:[#allocation2] sm:$0xff]  ;;  %v91_v17 = vld [vmem:[#allocation2 + $0x8] sm:$0xff]  ;;  %v93_v20 = vld [vmem:[#allocation2 + $0x18] sm:$0xff] }
  0x1a   :  { %129 = vmatpush.msra.mxu0 %v118_v3  ;;  %433 = vmatpush.msra.mxu3 %v118_v3  ;;  %v102_v19 = vld [vmem:[#allocation2 + $0x60] sm:$0xff]  ;;  %v103_v21 = vld [vmem:[#allocation2 + $0x68] sm:$0xff]  ;;  %v104_v23 = vld [vmem:[#allocation2 + $0x70] sm:$0xff] }
  0x1b   :  { %v94_v22 = vld [vmem:[#allocation2 + $0x20] sm:$0xff]  ;;  %v95_v24 = vld [vmem:[#allocation2 + $0x28] sm:$0xff]  ;;  %v105_v25 = vld [vmem:[#allocation2 + $0x78] sm:$0xff] }
  0x1c   :  { %130 = vmatpush.msra.mxu0 %v117_v4  ;;  %434 = vmatpush.msra.mxu3 %v117_v4  ;;  %v96_v26 = vld [vmem:[#allocation2 + $0x30] sm:$0xff]  ;;  %v97_v27 = vld [vmem:[#allocation2 + $0x38] sm:$0xff]  ;;  %v220_v30 = vld [vmem:[#allocation7 + $0x68] sm:$0xff] }
  0x1d   :  { %v222_v28 = vld [vmem:[#allocation7 + $0x78] sm:$0xff]  ;;  %v221_v29 = vld [vmem:[#allocation7 + $0x70] sm:$0xff]  ;;  %v219_v31 = vld [vmem:[#allocation7 + $0x60] sm:$0xff] }
  0x1e   :  { %131 = vmatpush.msra.mxu0 %v116_v5  ;;  %435 = vmatpush.msra.mxu3 %v116_v5  ;;  %v98_v32 = vld [vmem:[#allocation2 + $0x40] sm:$0xff]  ;;  %v218_v33 = vld [vmem:[#allocation7 + $0x58] sm:$0xff]  ;;  %v217_v34 = vld [vmem:[#allocation7 + $0x50] sm:$0xff] }
  0x1f   :  { %227 = vmatpush.msra.mxu1 %v222_v28  ;;  %v216_v35 = vld [vmem:[#allocation7 + $0x48] sm:$0xff]  ;;  %v215_v36 = vld [vmem:[#allocation7 + $0x40] sm:$0xff]  ;;  %v214_v38 = vld [vmem:[#allocation7 + $0x38] sm:$0xff] }
  0x20   :  { %132 = vmatpush.msra.mxu0 %v115_v6  ;;  %436 = vmatpush.msra.mxu3 %v115_v6  ;;  %v99_v37 = vld [vmem:[#allocation2 + $0x48] sm:$0xff]  ;;  %v213_v39 = vld [vmem:[#allocation7 + $0x30] sm:$0xff]  ;;  %v101_v42 = vld [vmem:[#allocation2 + $0x58] sm:$0xff] }
  0x21   :  { %228 = vmatpush.msra.mxu1 %v221_v29  ;;  %v212_v40 = vld [vmem:[#allocation7 + $0x28] sm:$0xff]  ;;  %v100_v41 = vld [vmem:[#allocation2 + $0x50] sm:$0xff]  ;;  %v211_v43 = vld [vmem:[#allocation7 + $0x20] sm:$0xff] }
  0x22   :  { %133 = vmatpush.msra.mxu0 %v114_v7  ;;  %437 = vmatpush.msra.mxu3 %v114_v7  ;;  %v210_v44 = vld [vmem:[#allocation7 + $0x18] sm:$0xff]  ;;  %v209_v45 = vld [vmem:[#allocation7 + $0x10] sm:$0xff]  ;;  %v208_v46 = vld [vmem:[#allocation7 + $0x8] sm:$0xff] }
  0x23   :  { %229 = vmatpush.msra.mxu1 %v220_v30  ;;  %v207_v47 = vld [vmem:[#allocation7] sm:$0xff] }
  0x24   :  { %134 = vmatpush.msra.mxu0 %v113_v8  ;;  %438 = vmatpush.msra.mxu3 %v113_v8  ;;  %v754_v48 = vld [vmem:[%s804_s2] ss:$0 sm:$0xff] }
  0x25   :  { %230 = vmatpush.msra.mxu1 %v219_v31 }
  0x26   :  { %135 = vmatpush.msra.mxu0 %v112_v9  ;;  %439 = vmatpush.msra.mxu3 %v112_v9 }
  0x27   :  { %231 = vmatpush.msra.mxu1 %v218_v33 }
  0x28   :  { %136 = vmatpush.msra.mxu0 %v111_v10  ;;  %440 = vmatpush.msra.mxu3 %v111_v10 }
  0x29   :  { %232 = vmatpush.msra.mxu1 %v217_v34 }
  0x2a   :  { %137 = vmatpush.msra.mxu0 %v110_v11  ;;  %441 = vmatpush.msra.mxu3 %v110_v11 }
  0x2b   :  { %233 = vmatpush.msra.mxu1 %v216_v35 }
  0x2c   :  { %138 = vmatpush.msra.mxu0 %v109_v12  ;;  %442 = vmatpush.msra.mxu3 %v109_v12 }
  0x2d   :  { %234 = vmatpush.msra.mxu1 %v215_v36 }
  0x2e   :  { %139 = vmatpush.msra.mxu0 %v108_v13  ;;  %443 = vmatpush.msra.mxu3 %v108_v13 }
  0x2f   :  { %235 = vmatpush.msra.mxu1 %v214_v38 }
  0x30   :  { %140 = vmatpush.msra.mxu0 %v107_v14  ;;  %444 = vmatpush.msra.mxu3 %v107_v14 }
  0x31   :  { %236 = vmatpush.msra.mxu1 %v213_v39 }
  0x32   :  { %141 = vmatpush.msra.mxu0 %v106_v15  ;;  %445 = vmatpush.msra.mxu3 %v106_v15 }
  0x33   :  { %142 = vmatmul.f32.vlgmr.msra.gmra.mxu0 %v90_v16  ;;  %178 = vmatmul.f32.vlgmr.msra.gmra.mxu3 %v102_v19 }
  0x34   :  { %446 = vmatpush.msrb.mxu3 %v222_v28  ;;  %237 = vmatpush.msra.mxu1 %v212_v40  ;;  %v319_v28 = vld [vmem:[#allocation8 + $0x58] sm:$0xff] }
  0x36   :  { %447 = vmatpush.msrb.mxu3 %v221_v29  ;;  %238 = vmatpush.msra.mxu1 %v211_v43 }
  0x38   :  { %448 = vmatpush.msrb.mxu3 %v220_v30  ;;  %239 = vmatpush.msra.mxu1 %v210_v44 }
  0x3a   :  { %449 = vmatpush.msrb.mxu3 %v219_v31  ;;  %240 = vmatpush.msra.mxu1 %v209_v45  ;;  %v318_v31 = vld [vmem:[#allocation8 + $0x50] sm:$0xff] }
  0x3b   :  { %145 = vmatmul.f32.gmra.mxu0 %v91_v17  ;;  %181 = vmatmul.f32.gmra.mxu3 %v103_v21 }
  0x3c   :  { %450 = vmatpush.msrb.mxu3 %v218_v33  ;;  %241 = vmatpush.msra.mxu1 %v208_v46  ;;  %v316_v33 = vld [vmem:[#allocation8 + $0x40] sm:$0xff] }
  0x3e   :  { %451 = vmatpush.msrb.mxu3 %v217_v34  ;;  %242 = vmatpush.msra.mxu1 %v207_v47 }
  0x40   :  { %452 = vmatpush.msrb.mxu3 %v216_v35  ;;  %v315_v35 = vld [vmem:[#allocation8 + $0x38] sm:$0xff] }
  0x42   :  { %453 = vmatpush.msrb.mxu3 %v215_v36 }
  0x43   :  { %148 = vmatmul.f32.gmra.mxu0 %v92_v18  ;;  %184 = vmatmul.f32.gmra.mxu3 %v104_v23  ;;  %v323_v23 = vld [vmem:[#allocation8 + $0x78] sm:$0xff] }
  0x44   :  { %454 = vmatpush.msrb.mxu3 %v214_v38  ;;  %328 = vmatpush.msra.mxu2 %v323_v23  ;;  %v314_v38 = vld [vmem:[#allocation8 + $0x30] sm:$0xff] }
  0x46   :  { %455 = vmatpush.msrb.mxu3 %v213_v39  ;;  %v313_v39 = vld [vmem:[#allocation8 + $0x28] sm:$0xff] }
  0x48   :  { %456 = vmatpush.msrb.mxu3 %v212_v40 }
  0x4a   :  { %457 = vmatpush.msrb.mxu3 %v211_v43 }
  0x4b   :  { %151 = vmatmul.f32.gmra.mxu0 %v93_v20  ;;  %187 = vmatmul.f32.gmra.mxu3 %v105_v25  ;;  %v321_v25 = vld [vmem:[#allocation8 + $0x68] sm:$0xff] }
  0x4c   :  { %458 = vmatpush.msrb.mxu3 %v210_v44  ;;  %v312_v44 = vld [vmem:[#allocation8 + $0x20] sm:$0xff] }
  0x4e   :  { %459 = vmatpush.msrb.mxu3 %v209_v45  ;;  %v311_v45 = vld [vmem:[#allocation8 + $0x18] sm:$0xff] }
  0x50   :  { %460 = vmatpush.msrb.mxu3 %v208_v46  ;;  %v310_v46 = vld [vmem:[#allocation8 + $0x10] sm:$0xff] }
  0x52   :  { %461 = vmatpush.msrb.mxu3 %v207_v47  ;;  %v309_v47 = vld [vmem:[#allocation8 + $0x8] sm:$0xff] }
  0x53   :  { %154 = vmatmul.f32.gmra.mxu0 %v94_v22 }
  0x54   :  { %462 = vmatpush.msra.mxu3 %v323_v23 }
  0x5b   :  { %157 = vmatmul.f32.gmra.mxu0 %v95_v24  ;;  %v322_v24 = vld [vmem:[#allocation8 + $0x70] sm:$0xff] }
  0x5c   :  { %329 = vmatpush.msra.mxu2 %v322_v24  ;;  %463 = vmatpush.msra.mxu3 %v322_v24 }
  0x5e   :  { %330 = vmatpush.msra.mxu2 %v321_v25  ;;  %464 = vmatpush.msra.mxu3 %v321_v25 }
  0x63   :  { %160 = vmatmul.f32.gmra.mxu0 %v96_v26  ;;  %v320_v26 = vld [vmem:[#allocation8 + $0x60] sm:$0xff] }
  0x64   :  { %331 = vmatpush.msra.mxu2 %v320_v26  ;;  %465 = vmatpush.msra.mxu3 %v320_v26 }
  0x66   :  { %332 = vmatpush.msra.mxu2 %v319_v28  ;;  %466 = vmatpush.msra.mxu3 %v319_v28 }
  0x68   :  { %333 = vmatpush.msra.mxu2 %v318_v31  ;;  %467 = vmatpush.msra.mxu3 %v318_v31 }
  0x6b   :  { %163 = vmatmul.f32.gmra.mxu0 %v97_v27 }
  0x73   :  { %166 = vmatmul.f32.gmra.mxu0 %v98_v32  ;;  %v317_v32 = vld [vmem:[#allocation8 + $0x48] sm:$0xff] }
  0x74   :  { %334 = vmatpush.msra.mxu2 %v317_v32  ;;  %468 = vmatpush.msra.mxu3 %v317_v32 }
  0x76   :  { %335 = vmatpush.msra.mxu2 %v316_v33  ;;  %469 = vmatpush.msra.mxu3 %v316_v33 }
  0x78   :  { %336 = vmatpush.msra.mxu2 %v315_v35  ;;  %470 = vmatpush.msra.mxu3 %v315_v35 }
  0x7a   :  { %337 = vmatpush.msra.mxu2 %v314_v38  ;;  %471 = vmatpush.msra.mxu3 %v314_v38 }
  0x7b   :  { %169 = vmatmul.f32.gmra.mxu0 %v99_v37 }
  0x7c   :  { %338 = vmatpush.msra.mxu2 %v313_v39  ;;  %472 = vmatpush.msra.mxu3 %v313_v39 }
  0x7e   :  { %339 = vmatpush.msra.mxu2 %v312_v44  ;;  %473 = vmatpush.msra.mxu3 %v312_v44 }
  0x80   :  { %340 = vmatpush.msra.mxu2 %v311_v45  ;;  %474 = vmatpush.msra.mxu3 %v311_v45 }
  0x82   :  { %341 = vmatpush.msra.mxu2 %v310_v46  ;;  %475 = vmatpush.msra.mxu3 %v310_v46 }
  0x83   :  { %172 = vmatmul.f32.gmra.mxu0 %v100_v41 }
  0x84   :  { %342 = vmatpush.msra.mxu2 %v309_v47  ;;  %476 = vmatpush.msra.mxu3 %v309_v47 }
  0x8b   :  { %175 = vmatmul.f32.gmra.mxu0 %v101_v42 }
  0xb0   :  { %v143_v49 = vpop.f32.mrf.mxu0 }
  0xb1   :  { %v144_v50 = vadd.f32 %v754_v48, %v143_v49  ;;  %v308_v49 = vld [vmem:[#allocation8] sm:$0xff] }
  0xb2   :  { %343 = vmatpush.msra.mxu2 %v308_v49  ;;  %477 = vmatpush.msra.mxu3 %v308_v49 }
  0xb3   :  { %488 = vtanh.f32 %v144_v50 }
  0xb6   :  { %v179_v60 = vpop.f32.mrf.mxu3 }
  0xb7   :  { %v180_v61 = vadd.f32 %v754_v48, %v179_v60 }
  0xb8   :  { %v146_v51 = vpop.f32.mrf.mxu0 }
  0xb9   :  { %v489_v52 = vpop.eup %488  ;;  %v147_v53 = vadd.f32 %v754_v48, %v146_v51 }
  0xba   :  { %243 = vmatmul.f32.vlgmr.msra.gmra.mxu1 %v489_v52 }
  0xbb   :  { %490 = vtanh.f32 %v147_v53 }
  0xbe   :  { %v182_v1 = vpop.f32.mrf.mxu3 }
  0xbf   :  { %v183_v3 = vadd.f32 %v754_v48, %v182_v1 }
  0xc0   :  { %v149_v54 = vpop.f32.mrf.mxu0 }
  0xc1   :  { %v491_v55 = vpop.eup %490  ;;  %v150_v56 = vadd.f32 %v754_v48, %v149_v54 }
  0xc2   :  { %246 = vmatmul.f32.gmra.mxu1 %v491_v55 }
  0xc3   :  { %492 = vtanh.f32 %v150_v56 }
  0xc6   :  { %v185_v7 = vpop.f32.mrf.mxu3 }
  0xc7   :  { %v186_v9 = vadd.f32 %v754_v48, %v185_v7 }
  0xc8   :  { %v152_v57 = vpop.f32.mrf.mxu0 }
  0xc9   :  { %v493_v58 = vpop.eup %492  ;;  %v153_v59 = vadd.f32 %v754_v48, %v152_v57 }
  0xca   :  { %249 = vmatmul.f32.gmra.mxu1 %v493_v58 }
  0xcb   :  { %494 = vtanh.f32 %v153_v59 }
  0xcc   :  { %496 = vtanh.f32 %v180_v61 }
  0xce   :  { %v188_v13 = vpop.f32.mrf.mxu3 }
  0xcf   :  { %v189_v15 = vadd.f32 %v754_v48, %v188_v13 }
  0xd0   :  { %v155_v62 = vpop.f32.mrf.mxu0 }
  0xd1   :  { %v495_v63 = vpop.eup %494  ;;  %v156_v0 = vadd.f32 %v754_v48, %v155_v62 }
  0xd2   :  { %252 = vmatmul.f32.gmra.mxu1 %v495_v63  ;;  %v497_v2 = vpop.eup %496 }
  0xd3   :  { %498 = vtanh.f32 %v156_v0  ;;  %279 = vmatmul.f32.vlgmr.msrb.gmra.mxu3 %v497_v2 }
  0xd4   :  { %500 = vtanh.f32 %v183_v3 }
  0xd8   :  { %v158_v4 = vpop.f32.mrf.mxu0 }
  0xd9   :  { %v499_v5 = vpop.eup %498  ;;  %v159_v6 = vadd.f32 %v754_v48, %v158_v4 }
  0xda   :  { %255 = vmatmul.f32.gmra.mxu1 %v499_v5  ;;  %v501_v8 = vpop.eup %500 }
  0xdb   :  { %502 = vtanh.f32 %v159_v6  ;;  %282 = vmatmul.f32.gmra.mxu3 %v501_v8 }
  0xdc   :  { %504 = vtanh.f32 %v186_v9 }
  0xe0   :  { %v161_v10 = vpop.f32.mrf.mxu0 }
  0xe1   :  { %v503_v11 = vpop.eup %502  ;;  %v162_v12 = vadd.f32 %v754_v48, %v161_v10 }
  0xe2   :  { %258 = vmatmul.f32.gmra.mxu1 %v503_v11  ;;  %v505_v14 = vpop.eup %504 }
  0xe3   :  { %506 = vtanh.f32 %v162_v12  ;;  %285 = vmatmul.f32.gmra.mxu3 %v505_v14 }
  0xe4   :  { %508 = vtanh.f32 %v189_v15 }
  0xe8   :  { %v164_v16 = vpop.f32.mrf.mxu0 }
  0xe9   :  { %v507_v17 = vpop.eup %506  ;;  %v165_v18 = vadd.f32 %v754_v48, %v164_v16 }
  0xea   :  { %261 = vmatmul.f32.gmra.mxu1 %v507_v17  ;;  %v509_v19 = vpop.eup %508 }
  0xeb   :  { %510 = vtanh.f32 %v165_v18  ;;  %288 = vmatmul.f32.gmra.mxu3 %v509_v19 }
  0xf0   :  { %v167_v20 = vpop.f32.mrf.mxu0 }
  0xf1   :  { %v511_v21 = vpop.eup %510  ;;  %v168_v22 = vadd.f32 %v754_v48, %v167_v20 }
  0xf2   :  { %264 = vmatmul.f32.gmra.mxu1 %v511_v21 }
  0xf3   :  { %512 = vtanh.f32 %v168_v22 }
  0xf8   :  { %v170_v27 = vpop.f32.mrf.mxu0 }
  0xf9   :  { %v513_v29 = vpop.eup %512  ;;  %v171_v30 = vadd.f32 %v754_v48, %v170_v27 }
  0xfa   :  { %267 = vmatmul.f32.gmra.mxu1 %v513_v29 }
  0xfb   :  { %514 = vtanh.f32 %v171_v30 }
 0x100   :  { %v173_v34 = vpop.f32.mrf.mxu0 }
 0x101   :  { %v515_v36 = vpop.eup %514  ;;  %v174_v37 = vadd.f32 %v754_v48, %v173_v34  ;;  %v487_v34 = vld [vmem:[%s808_s6] ss:$0 sm:$0xff]  ;;  %s686_s6 = smov [#allocation10]  }
 0x102   :  { %270 = vmatmul.f32.gmra.mxu1 %v515_v36  ;;  %s413_s23 = sshll.u32 %s686_s6, 4  ;;  %s414_s23 = int_to_ptr.vmem [resolvable:$true] %s413_s23 }
 0x103   :  { %516 = vtanh.f32 %v174_v37 }
 0x108   :  { %v176_v40 = vpop.f32.mrf.mxu0 }
 0x109   :  { %v517_v41 = vpop.eup %516  ;;  %v177_v42 = vadd.f32 %v754_v48, %v176_v40  ;;  %v775_v48 = vld [vmem:[%s806_s4] ss:$0 sm:$0xff] }
 0x10a   :  { %273 = vmatmul.f32.gmra.mxu1 %v517_v41 }
 0x10b   :  { %518 = vtanh.f32 %v177_v42 }
 0x111   :  { %v519_v43 = vpop.eup %518 }
 0x112   :  { %276 = vmatmul.f32.gmra.mxu1 %v519_v43 }
 0x137   :  { %v244_v50 = vpop.f32.mrf.mxu1 }
 0x138   :  { %v245_v51 = vadd.f32 %v775_v48, %v244_v50 }
 0x13a   :  { %520 = vtanh.f32 %v245_v51 }
 0x13f   :  { %v247_v52 = vpop.f32.mrf.mxu1 }
 0x140   :  { %v521_v53 = vpop.eup %520  ;;  %v248_v54 = vadd.f32 %v775_v48, %v247_v52 }
 0x141   :  { %344 = vmatmul.f32.vlgmr.msra.gmra.mxu2 %v521_v53 }
 0x142   :  { %522 = vtanh.f32 %v248_v54 }
 0x147   :  { %v250_v55 = vpop.f32.mrf.mxu1 }
 0x148   :  { %v523_v56 = vpop.eup %522  ;;  %v251_v57 = vadd.f32 %v775_v48, %v250_v55 }
 0x149   :  { %347 = vmatmul.f32.gmra.mxu2 %v523_v56 }
 0x14a   :  { %524 = vtanh.f32 %v251_v57 }
 0x14f   :  { %v253_v58 = vpop.f32.mrf.mxu1 }
 0x150   :  { %v525_v59 = vpop.eup %524  ;;  %v254_v60 = vadd.f32 %v775_v48, %v253_v58 }
 0x151   :  { %350 = vmatmul.f32.gmra.mxu2 %v525_v59 }
 0x152   :  { %526 = vtanh.f32 %v254_v60 }
 0x156   :  { %v280_v62 = vpop.f32.mrf.mxu3 }
 0x157   :  { %v256_v61 = vpop.f32.mrf.mxu1  ;;  %v281_v1 = vadd.f32 %v775_v48, %v280_v62 }
 0x158   :  { %v527_v63 = vpop.eup %526  ;;  %v257_v0 = vadd.f32 %v775_v48, %v256_v61 }
 0x159   :  { %353 = vmatmul.f32.gmra.mxu2 %v527_v63 }
 0x15a   :  { %528 = vtanh.f32 %v257_v0 }
 0x15b   :  { %530 = vtanh.f32 %v281_v1 }
 0x15e   :  { %v283_v3 = vpop.f32.mrf.mxu3 }
 0x15f   :  { %v259_v2 = vpop.f32.mrf.mxu1  ;;  %v284_v6 = vadd.f32 %v775_v48, %v283_v3 }
 0x160   :  { %v529_v4 = vpop.eup %528  ;;  %v260_v5 = vadd.f32 %v775_v48, %v259_v2 }
 0x161   :  { %v531_v7 = vpop.eup %530  ;;  %356 = vmatmul.f32.gmra.mxu2 %v529_v4 }
 0x162   :  { %532 = vtanh.f32 %v260_v5  ;;  %380 = vmatmul.f32.vlgmr.msra.gmra.mxu3 %v531_v7 }
 0x163   :  { %534 = vtanh.f32 %v284_v6 }
 0x166   :  { %v286_v9 = vpop.f32.mrf.mxu3 }
 0x167   :  { %v262_v8 = vpop.f32.mrf.mxu1  ;;  %v287_v12 = vadd.f32 %v775_v48, %v286_v9 }
 0x168   :  { %v533_v10 = vpop.eup %532  ;;  %v263_v11 = vadd.f32 %v775_v48, %v262_v8 }
 0x169   :  { %v535_v13 = vpop.eup %534  ;;  %359 = vmatmul.f32.gmra.mxu2 %v533_v10 }
 0x16a   :  { %536 = vtanh.f32 %v263_v11  ;;  %383 = vmatmul.f32.gmra.mxu3 %v535_v13 }
 0x16b   :  { %538 = vtanh.f32 %v287_v12 }
 0x16e   :  { %v289_v15 = vpop.f32.mrf.mxu3 }
 0x16f   :  { %v265_v14 = vpop.f32.mrf.mxu1  ;;  %v290_v18 = vadd.f32 %v775_v48, %v289_v15 }
 0x170   :  { %v537_v16 = vpop.eup %536  ;;  %v266_v17 = vadd.f32 %v775_v48, %v265_v14 }
 0x171   :  { %v539_v19 = vpop.eup %538  ;;  %362 = vmatmul.f32.gmra.mxu2 %v537_v16 }
 0x172   :  { %540 = vtanh.f32 %v266_v17  ;;  %386 = vmatmul.f32.gmra.mxu3 %v539_v19 }
 0x173   :  { %542 = vtanh.f32 %v290_v18 }
 0x177   :  { %v268_v20 = vpop.f32.mrf.mxu1 }
 0x178   :  { %v541_v21 = vpop.eup %540  ;;  %v269_v22 = vadd.f32 %v775_v48, %v268_v20 }
 0x179   :  { %v543_v23 = vpop.eup %542  ;;  %365 = vmatmul.f32.gmra.mxu2 %v541_v21 }
 0x17a   :  { %544 = vtanh.f32 %v269_v22  ;;  %389 = vmatmul.f32.gmra.mxu3 %v543_v23 }
 0x17f   :  { %v271_v24 = vpop.f32.mrf.mxu1 }
 0x180   :  { %v545_v25 = vpop.eup %544  ;;  %v272_v26 = vadd.f32 %v775_v48, %v271_v24 }
 0x181   :  { %368 = vmatmul.f32.gmra.mxu2 %v545_v25 }
 0x182   :  { %546 = vtanh.f32 %v272_v26 }
 0x187   :  { %v274_v27 = vpop.f32.mrf.mxu1 }
 0x188   :  { %v547_v28 = vpop.eup %546  ;;  %v275_v29 = vadd.f32 %v775_v48, %v274_v27 }
 0x189   :  { %371 = vmatmul.f32.gmra.mxu2 %v547_v28 }
 0x18a   :  { %548 = vtanh.f32 %v275_v29 }
 0x18f   :  { %v277_v30 = vpop.f32.mrf.mxu1 }
 0x190   :  { %v549_v31 = vpop.eup %548  ;;  %v278_v32 = vadd.f32 %v775_v48, %v277_v30 }
 0x191   :  { %374 = vmatmul.f32.gmra.mxu2 %v549_v31 }
 0x192   :  { %550 = vtanh.f32 %v278_v32 }
 0x198   :  { %v551_v33 = vpop.eup %550 }
 0x199   :  { %377 = vmatmul.f32.gmra.mxu2 %v551_v33 }
 0x1c4   :  { %v345_v35 = vpop.f32.mrf.mxu2 }
 0x1c5   :  { %v346_v36 = vadd.f32 %v487_v34, %v345_v35 }
 0x1c7   :  { %393 = vst [vmem:[#allocation10] sm:$0xff] %v346_v36 }
 0x1cc   :  { %v348_v37 = vpop.f32.mrf.mxu2 }
 0x1cd   :  { %v349_v38 = vadd.f32 %v487_v34, %v348_v37 }
 0x1cf   :  { %394 = vst [vmem:[#allocation10 + $0x8] sm:$0xff] %v349_v38 }
 0x1d4   :  { %v351_v39 = vpop.f32.mrf.mxu2 }
 0x1d5   :  { %v352_v40 = vadd.f32 %v487_v34, %v351_v39 }
 0x1d7   :  { %395 = vst [vmem:[#allocation10 + $0x10] sm:$0xff] %v352_v40 }
 0x1dc   :  { %v354_v41 = vpop.f32.mrf.mxu2 }
 0x1dd   :  { %v355_v42 = vadd.f32 %v487_v34, %v354_v41 }
 0x1df   :  { %396 = vst [vmem:[#allocation10 + $0x18] sm:$0xff] %v355_v42 }
 0x1e4   :  { %v357_v43 = vpop.f32.mrf.mxu2 }
 0x1e5   :  { %v358_v44 = vadd.f32 %v487_v34, %v357_v43  ;;  %v381_v45 = vpop.f32.mrf.mxu3 }
 0x1e6   :  { %v382_v46 = vadd.f32 %v487_v34, %v381_v45 }
 0x1e7   :  { %397 = vst [vmem:[#allocation10 + $0x20] sm:$0xff] %v358_v44 }
 0x1e8   :  { %405 = vst [vmem:[#allocation10 + $0x60] sm:$0xff] %v382_v46 }
 0x1ec   :  { %v360_v47 = vpop.f32.mrf.mxu2 }
 0x1ed   :  { %v361_v49 = vadd.f32 %v487_v34, %v360_v47  ;;  %v384_v48 = vpop.f32.mrf.mxu3 }
 0x1ee   :  { %v385_v50 = vadd.f32 %v487_v34, %v384_v48 }
 0x1ef   :  { %398 = vst [vmem:[#allocation10 + $0x28] sm:$0xff] %v361_v49 }
 0x1f0   :  { %406 = vst [vmem:[#allocation10 + $0x68] sm:$0xff] %v385_v50 }
 0x1f4   :  { %v363_v51 = vpop.f32.mrf.mxu2 }
 0x1f5   :  { %v364_v52 = vadd.f32 %v487_v34, %v363_v51  ;;  %v387_v53 = vpop.f32.mrf.mxu3 }
 0x1f6   :  { %v388_v54 = vadd.f32 %v487_v34, %v387_v53 }
 0x1f7   :  { %399 = vst [vmem:[#allocation10 + $0x30] sm:$0xff] %v364_v52 }
 0x1f8   :  { %407 = vst [vmem:[#allocation10 + $0x70] sm:$0xff] %v388_v54 }
 0x1fc   :  { %v366_v55 = vpop.f32.mrf.mxu2 }
 0x1fd   :  { %v367_v56 = vadd.f32 %v487_v34, %v366_v55  ;;  %v390_v57 = vpop.f32.mrf.mxu3 }
 0x1fe   :  { %v391_v58 = vadd.f32 %v487_v34, %v390_v57 }
 0x1ff   :  { %400 = vst [vmem:[#allocation10 + $0x38] sm:$0xff] %v367_v56 }
 0x200   :  { %408 = vst [vmem:[#allocation10 + $0x78] sm:$0xff] %v391_v58 }
 0x204   :  { %v369_v59 = vpop.f32.mrf.mxu2 }
 0x205   :  { %v370_v60 = vadd.f32 %v487_v34, %v369_v59 }
 0x207   :  { %401 = vst [vmem:[#allocation10 + $0x40] sm:$0xff] %v370_v60 }
 0x20c   :  { %v372_v61 = vpop.f32.mrf.mxu2 }
 0x20d   :  { %v373_v62 = vadd.f32 %v487_v34, %v372_v61 }
 0x20f   :  { %402 = vst [vmem:[#allocation10 + $0x48] sm:$0xff] %v373_v62 }
 0x214   :  { %v375_v63 = vpop.f32.mrf.mxu2 }
 0x215   :  { %v376_v0 = vadd.f32 %v487_v34, %v375_v63 }
 0x217   :  { %403 = vst [vmem:[#allocation10 + $0x50] sm:$0xff] %v376_v0 }
 0x21c   :  { %v378_v1 = vpop.f32.mrf.mxu2 }
 0x21d   :  { %v379_v2 = vadd.f32 %v487_v34, %v378_v1 }
 0x21f   :  { %404 = vst [vmem:[#allocation10 + $0x58] sm:$0xff] %v379_v2 }
 0x220   :  { %421 = dma.vmem_to_hbm [thread:$0]  %s414_s23, 2048, %s416_s26, [#allocation4], %s681_s9, %s681_s9, %s682_s10  }
 0x221   :  { %678 = dma.done.wait [#allocation4], 2048  }
 0x222   :  { %679 = vsyncadd [#allocation4], 4294965248 }
 0x223   :  { %426 = vsyncpa [#allocation3], 1 }
 0x224   :  { %427 = vsyncpa [#allocation6], 1 }
 0x225   :  { %428 = vsyncpa [#allocation9], 1 }
 0x226   :  { %429 = vsyncpa [#allocation4], 1 }

// kernel: tpu_custom_call.1
= control target key start
LH: loop header
LB: loop body
LE: loop exit
PB: predicated region body
PF: predicated region fallthrough
CT: control target
= control target key end

     0   :  { %12 = vsyncpa [#allocation3], 0  ;;  %s802_s0 = inlined_call_operand.hbm [shape: f32[128,128], index: 0, kind: input, shape index: {}]   ;;  %s803_s1 = inlined_call_operand.hbm [shape: f32[128,128], index: 1, kind: input, shape index: {}]   ;;  %s804_s2 = inlined_call_operand.vmem [shape: f32[1,128], index: 2, kind: input, shape index: {}]   ;;  %s805_s3 = inlined_call_operand.hbm [shape: f32[128,128], index: 3, kind: input, shape index: {}]   ;;  %s806_s4 = inlined_call_operand.vmem [shape: f32[1,128], index: 4, kind: input, shape index: {}]   ;;  %s807_s5 = inlined_call_operand.hbm [shape: f32[128,128], index: 5, kind: input, shape index: {}]   ;;  %s808_s6 = inlined_call_operand.vmem [shape: f32[1,128], index: 6, kind: input, shape index: {}]   ;;  %s809_s7 = inlined_call_operand.hbm [shape: f32[128,128], index: 7, kind: output, shape index: {}]  }
   0x1   :  { %13 = vsyncpa [#allocation6], 0 }
   0x2   :  { %14 = vsyncpa [#allocation9], 0 }
   0x3   :  { %15 = vsyncpa [#allocation4], 0  ;;  %s33_s26 = sshll.u32 %s803_s1, 4  ;;  %s680_s27 = smov [#allocation5]   ;;  %s34_s26 = int_to_ptr.hbm [resolvable:$true] %s33_s26 }
   0x4   :  { %s35_s28 = sshll.u32 %s680_s27, 4  ;;  %s20_s8 = sshll.u32 %s802_s0, 4  ;;  %s36_s28 = int_to_ptr.vmem [resolvable:$true] %s35_s28  ;;  %s21_s8 = int_to_ptr.hbm [resolvable:$true] %s20_s8 }
   0x5   :  { %s681_s9 = smov 128   ;;  %s682_s10 = smov 8  }
   0x6   :  { %41 = dma.hbm_to_vmem [thread:$0]  %s34_s26, 2048, %s36_s28, [#allocation6], %s681_s9, %s681_s9, %s682_s10  }
   0x7   :  { %s683_s11 = smov [#allocation2]   ;;  %s48_s1 = sshll.u32 %s805_s3, 4  ;;  %s49_s1 = int_to_ptr.hbm [resolvable:$true] %s48_s1 }
   0x8   :  { %s22_s12 = sshll.u32 %s683_s11, 4  ;;  %s63_s16 = sshll.u32 %s807_s5, 4  ;;  %s23_s12 = int_to_ptr.vmem [resolvable:$true] %s22_s12  ;;  %s64_s16 = int_to_ptr.hbm [resolvable:$true] %s63_s16 }
   0x9   :  { %28 = dma.hbm_to_vmem [thread:$0]  %s21_s8, 2048, %s23_s12, [#allocation3], %s681_s9, %s681_s9, %s682_s10  }
   0xa   :  { %s684_s17 = smov [#allocation7]   ;;  %s685_s19 = smov [#allocation8]  }
   0xb   :  { %s50_s18 = sshll.u32 %s684_s17, 4  ;;  %s65_s3 = sshll.u32 %s685_s19, 4  ;;  %s51_s18 = int_to_ptr.vmem [resolvable:$true] %s50_s18  ;;  %s66_s3 = int_to_ptr.vmem [resolvable:$true] %s65_s3 }
   0xc   :  { %56 = dma.hbm_to_vmem [thread:$0]  %s49_s1, 2048, %s51_s18, [#allocation6], %s681_s9, %s681_s9, %s682_s10  }
   0xd   :  { %71 = dma.hbm_to_vmem [thread:$0]  %s64_s16, 2048, %s66_s3, [#allocation9], %s681_s9, %s681_s9, %s682_s10  }
   0xe   :  { %672 = dma.done.wait [#allocation3], 2048  }
   0xf   :  { %673 = vsyncadd [#allocation3], 4294965248 }
  0x10   :  { %674 = dma.done.wait [#allocation6], 4096  }
  0x11   :  { %675 = vsyncadd [#allocation6], 4294963200 }
  0x12   :  { %676 = dma.done.wait [#allocation9], 2048  }
  0x13   :  { %677 = vsyncadd [#allocation9], 4294965248  ;;  %v121_v0 = vld [vmem:[#allocation5 + $0x78] sm:$0xff]  ;;  %v120_v1 = vld [vmem:[#allocation5 + $0x70] sm:$0xff]  ;;  %s415_s26 = sshll.u32 %s809_s7, 4  ;;  %s416_s26 = int_to_ptr.hbm [resolvable:$true] %s415_s26 }
  0x14   :  { %126 = vmatpush.msra.mxu0 %v121_v0  ;;  %430 = vmatpush.msra.mxu3 %v121_v0  ;;  %v119_v2 = vld [vmem:[#allocation5 + $0x68] sm:$0xff]  ;;  %v118_v3 = vld [vmem:[#allocation5 + $0x60] sm:$0xff]  ;;  %v117_v4 = vld [vmem:[#allocation5 + $0x58] sm:$0xff] }
  0x15   :  { %v116_v5 = vld [vmem:[#allocation5 + $0x50] sm:$0xff]  ;;  %v115_v6 = vld [vmem:[#allocation5 + $0x48] sm:$0xff]  ;;  %v114_v7 = vld [vmem:[#allocation5 + $0x40] sm:$0xff] }
  0x16   :  { %127 = vmatpush.msra.mxu0 %v120_v1  ;;  %431 = vmatpush.msra.mxu3 %v120_v1  ;;  %v113_v8 = vld [vmem:[#allocation5 + $0x38] sm:$0xff]  ;;  %v112_v9 = vld [vmem:[#allocation5 + $0x30] sm:$0xff]  ;;  %v111_v10 = vld [vmem:[#allocation5 + $0x28] sm:$0xff] }
  0x17   :  { %v110_v11 = vld [vmem:[#allocation5 + $0x20] sm:$0xff]  ;;  %v109_v12 = vld [vmem:[#allocation5 + $0x18] sm:$0xff]  ;;  %v108_v13 = vld [vmem:[#allocation5 + $0x10] sm:$0xff] }
  0x18   :  { %128 = vmatpush.msra.mxu0 %v119_v2  ;;  %432 = vmatpush.msra.mxu3 %v119_v2  ;;  %v107_v14 = vld [vmem:[#allocation5 + $0x8] sm:$0xff]  ;;  %v106_v15 = vld [vmem:[#allocation5] sm:$0xff]  ;;  %v92_v18 = vld [vmem:[#allocation2 + $0x10] sm:$0xff] }
  0x19   :  { %v90_v16 = vld [vmem:[#allocation2] sm:$0xff]  ;;  %v91_v17 = vld [vmem:[#allocation2 + $0x8] sm:$0xff]  ;;  %v93_v20 = vld [vmem:[#allocation2 + $0x18] sm:$0xff] }
  0x1a   :  { %129 = vmatpush.msra.mxu0 %v118_v3  ;;  %433 = vmatpush.msra.mxu3 %v118_v3  ;;  %v102_v19 = vld [vmem:[#allocation2 + $0x60] sm:$0xff]  ;;  %v103_v21 = vld [vmem:[#allocation2 + $0x68] sm:$0xff]  ;;  %v104_v23 = vld [vmem:[#allocation2 + $0x70] sm:$0xff] }
  0x1b   :  { %v94_v22 = vld [vmem:[#allocation2 + $0x20] sm:$0xff]  ;;  %v95_v24 = vld [vmem:[#allocation2 + $0x28] sm:$0xff]  ;;  %v105_v25 = vld [vmem:[#allocation2 + $0x78] sm:$0xff] }
  0x1c   :  { %130 = vmatpush.msra.mxu0 %v117_v4  ;;  %434 = vmatpush.msra.mxu3 %v117_v4  ;;  %v96_v26 = vld [vmem:[#allocation2 + $0x30] sm:$0xff]  ;;  %v97_v27 = vld [vmem:[#allocation2 + $0x38] sm:$0xff]  ;;  %v220_v30 = vld [vmem:[#allocation7 + $0x68] sm:$0xff] }
  0x1d   :  { %v222_v28 = vld [vmem:[#allocation7 + $0x78] sm:$0xff]  ;;  %v221_v29 = vld [vmem:[#allocation7 + $0x70] sm:$0xff]  ;;  %v219_v31 = vld [vmem:[#allocation7 + $0x60] sm:$0xff] }
  0x1e   :  { %131 = vmatpush.msra.mxu0 %v116_v5  ;;  %435 = vmatpush.msra.mxu3 %v116_v5  ;;  %v98_v32 = vld [vmem:[#allocation2 + $0x40] sm:$0xff]  ;;  %v218_v33 = vld [vmem:[#allocation7 + $0x58] sm:$0xff]  ;;  %v217_v34 = vld [vmem:[#allocation7 + $0x50] sm:$0xff] }
  0x1f   :  { %227 = vmatpush.msra.mxu1 %v222_v28  ;;  %v216_v35 = vld [vmem:[#allocation7 + $0x48] sm:$0xff]  ;;  %v215_v36 = vld [vmem:[#allocation7 + $0x40] sm:$0xff]  ;;  %v214_v38 = vld [vmem:[#allocation7 + $0x38] sm:$0xff] }
  0x20   :  { %132 = vmatpush.msra.mxu0 %v115_v6  ;;  %436 = vmatpush.msra.mxu3 %v115_v6  ;;  %v99_v37 = vld [vmem:[#allocation2 + $0x48] sm:$0xff]  ;;  %v213_v39 = vld [vmem:[#allocation7 + $0x30] sm:$0xff]  ;;  %v101_v42 = vld [vmem:[#allocation2 + $0x58] sm:$0xff] }
  0x21   :  { %228 = vmatpush.msra.mxu1 %v221_v29  ;;  %v212_v40 = vld [vmem:[#allocation7 + $0x28] sm:$0xff]  ;;  %v100_v41 = vld [vmem:[#allocation2 + $0x50] sm:$0xff]  ;;  %v211_v43 = vld [vmem:[#allocation7 + $0x20] sm:$0xff] }
  0x22   :  { %133 = vmatpush.msra.mxu0 %v114_v7  ;;  %437 = vmatpush.msra.mxu3 %v114_v7  ;;  %v210_v44 = vld [vmem:[#allocation7 + $0x18] sm:$0xff]  ;;  %v209_v45 = vld [vmem:[#allocation7 + $0x10] sm:$0xff]  ;;  %v208_v46 = vld [vmem:[#allocation7 + $0x8] sm:$0xff] }
  0x23   :  { %229 = vmatpush.msra.mxu1 %v220_v30  ;;  %v207_v47 = vld [vmem:[#allocation7] sm:$0xff] }
  0x24   :  { %134 = vmatpush.msra.mxu0 %v113_v8  ;;  %438 = vmatpush.msra.mxu3 %v113_v8  ;;  %v754_v48 = vld [vmem:[%s804_s2] ss:$0 sm:$0xff] }
  0x25   :  { %230 = vmatpush.msra.mxu1 %v219_v31 }
  0x26   :  { %135 = vmatpush.msra.mxu0 %v112_v9  ;;  %439 = vmatpush.msra.mxu3 %v112_v9 }
  0x27   :  { %231 = vmatpush.msra.mxu1 %v218_v33 }
  0x28   :  { %136 = vmatpush.msra.mxu0 %v111_v10  ;;  %440 = vmatpush.msra.mxu3 %v111_v10 }
  0x29   :  { %232 = vmatpush.msra.mxu1 %v217_v34 }
  0x2a   :  { %137 = vmatpush.msra.mxu0 %v110_v11  ;;  %441 = vmatpush.msra.mxu3 %v110_v11 }
  0x2b   :  { %233 = vmatpush.msra.mxu1 %v216_v35 }
  0x2c   :  { %138 = vmatpush.msra.mxu0 %v109_v12  ;;  %442 = vmatpush.msra.mxu3 %v109_v12 }
  0x2d   :  { %234 = vmatpush.msra.mxu1 %v215_v36 }
  0x2e   :  { %139 = vmatpush.msra.mxu0 %v108_v13  ;;  %443 = vmatpush.msra.mxu3 %v108_v13 }
  0x2f   :  { %235 = vmatpush.msra.mxu1 %v214_v38 }
  0x30   :  { %140 = vmatpush.msra.mxu0 %v107_v14  ;;  %444 = vmatpush.msra.mxu3 %v107_v14 }
  0x31   :  { %236 = vmatpush.msra.mxu1 %v213_v39 }
  0x32   :  { %141 = vmatpush.msra.mxu0 %v106_v15  ;;  %445 = vmatpush.msra.mxu3 %v106_v15 }
  0x33   :  { %142 = vmatmul.f32.vlgmr.msra.gmra.mxu0 %v90_v16  ;;  %178 = vmatmul.f32.vlgmr.msra.gmra.mxu3 %v102_v19 }
  0x34   :  { %446 = vmatpush.msrb.mxu3 %v222_v28  ;;  %237 = vmatpush.msra.mxu1 %v212_v40  ;;  %v319_v28 = vld [vmem:[#allocation8 + $0x58] sm:$0xff] }
  0x36   :  { %447 = vmatpush.msrb.mxu3 %v221_v29  ;;  %238 = vmatpush.msra.mxu1 %v211_v43 }
  0x38   :  { %448 = vmatpush.msrb.mxu3 %v220_v30  ;;  %239 = vmatpush.msra.mxu1 %v210_v44 }
  0x3a   :  { %449 = vmatpush.msrb.mxu3 %v219_v31  ;;  %240 = vmatpush.msra.mxu1 %v209_v45  ;;  %v318_v31 = vld [vmem:[#allocation8 + $0x50] sm:$0xff] }
  0x3b   :  { %145 = vmatmul.f32.gmra.mxu0 %v91_v17  ;;  %181 = vmatmul.f32.gmra.mxu3 %v103_v21 }
  0x3c   :  { %450 = vmatpush.msrb.mxu3 %v218_v33  ;;  %241 = vmatpush.msra.mxu1 %v208_v46  ;;  %v316_v33 = vld [vmem:[#allocation8 + $0x40] sm:$0xff] }
  0x3e   :  { %451 = vmatpush.msrb.mxu3 %v217_v34  ;;  %242 = vmatpush.msra.mxu1 %v207_v47 }
  0x40   :  { %452 = vmatpush.msrb.mxu3 %v216_v35  ;;  %v315_v35 = vld [vmem:[#allocation8 + $0x38] sm:$0xff] }
  0x42   :  { %453 = vmatpush.msrb.mxu3 %v215_v36 }
  0x43   :  { %148 = vmatmul.f32.gmra.mxu0 %v92_v18  ;;  %184 = vmatmul.f32.gmra.mxu3 %v104_v23  ;;  %v323_v23 = vld [vmem:[#allocation8 + $0x78] sm:$0xff] }
  0x44   :  { %454 = vmatpush.msrb.mxu3 %v214_v38  ;;  %328 = vmatpush.msra.mxu2 %v323_v23  ;;  %v314_v38 = vld [vmem:[#allocation8 + $0x30] sm:$0xff] }
  0x46   :  { %455 = vmatpush.msrb.mxu3 %v213_v39  ;;  %v313_v39 = vld [vmem:[#allocation8 + $0x28] sm:$0xff] }
  0x48   :  { %456 = vmatpush.msrb.mxu3 %v212_v40 }
  0x4a   :  { %457 = vmatpush.msrb.mxu3 %v211_v43 }
  0x4b   :  { %151 = vmatmul.f32.gmra.mxu0 %v93_v20  ;;  %187 = vmatmul.f32.gmra.mxu3 %v105_v25  ;;  %v321_v25 = vld [vmem:[#allocation8 + $0x68] sm:$0xff] }
  0x4c   :  { %458 = vmatpush.msrb.mxu3 %v210_v44  ;;  %v312_v44 = vld [vmem:[#allocation8 + $0x20] sm:$0xff] }
  0x4e   :  { %459 = vmatpush.msrb.mxu3 %v209_v45  ;;  %v311_v45 = vld [vmem:[#allocation8 + $0x18] sm:$0xff] }
  0x50   :  { %460 = vmatpush.msrb.mxu3 %v208_v46  ;;  %v310_v46 = vld [vmem:[#allocation8 + $0x10] sm:$0xff] }
  0x52   :  { %461 = vmatpush.msrb.mxu3 %v207_v47  ;;  %v309_v47 = vld [vmem:[#allocation8 + $0x8] sm:$0xff] }
  0x53   :  { %154 = vmatmul.f32.gmra.mxu0 %v94_v22 }
  0x54   :  { %462 = vmatpush.msra.mxu3 %v323_v23 }
  0x5b   :  { %157 = vmatmul.f32.gmra.mxu0 %v95_v24  ;;  %v322_v24 = vld [vmem:[#allocation8 + $0x70] sm:$0xff] }
  0x5c   :  { %329 = vmatpush.msra.mxu2 %v322_v24  ;;  %463 = vmatpush.msra.mxu3 %v322_v24 }
  0x5e   :  { %330 = vmatpush.msra.mxu2 %v321_v25  ;;  %464 = vmatpush.msra.mxu3 %v321_v25 }
  0x63   :  { %160 = vmatmul.f32.gmra.mxu0 %v96_v26  ;;  %v320_v26 = vld [vmem:[#allocation8 + $0x60] sm:$0xff] }
  0x64   :  { %331 = vmatpush.msra.mxu2 %v320_v26  ;;  %465 = vmatpush.msra.mxu3 %v320_v26 }
  0x66   :  { %332 = vmatpush.msra.mxu2 %v319_v28  ;;  %466 = vmatpush.msra.mxu3 %v319_v28 }
  0x68   :  { %333 = vmatpush.msra.mxu2 %v318_v31  ;;  %467 = vmatpush.msra.mxu3 %v318_v31 }
  0x6b   :  { %163 = vmatmul.f32.gmra.mxu0 %v97_v27 }
  0x73   :  { %166 = vmatmul.f32.gmra.mxu0 %v98_v32  ;;  %v317_v32 = vld [vmem:[#allocation8 + $0x48] sm:$0xff] }
  0x74   :  { %334 = vmatpush.msra.mxu2 %v317_v32  ;;  %468 = vmatpush.msra.mxu3 %v317_v32 }
  0x76   :  { %335 = vmatpush.msra.mxu2 %v316_v33  ;;  %469 = vmatpush.msra.mxu3 %v316_v33 }
  0x78   :  { %336 = vmatpush.msra.mxu2 %v315_v35  ;;  %470 = vmatpush.msra.mxu3 %v315_v35 }
  0x7a   :  { %337 = vmatpush.msra.mxu2 %v314_v38  ;;  %471 = vmatpush.msra.mxu3 %v314_v38 }
  0x7b   :  { %169 = vmatmul.f32.gmra.mxu0 %v99_v37 }
  0x7c   :  { %338 = vmatpush.msra.mxu2 %v313_v39  ;;  %472 = vmatpush.msra.mxu3 %v313_v39 }
  0x7e   :  { %339 = vmatpush.msra.mxu2 %v312_v44  ;;  %473 = vmatpush.msra.mxu3 %v312_v44 }
  0x80   :  { %340 = vmatpush.msra.mxu2 %v311_v45  ;;  %474 = vmatpush.msra.mxu3 %v311_v45 }
  0x82   :  { %341 = vmatpush.msra.mxu2 %v310_v46  ;;  %475 = vmatpush.msra.mxu3 %v310_v46 }
  0x83   :  { %172 = vmatmul.f32.gmra.mxu0 %v100_v41 }
  0x84   :  { %342 = vmatpush.msra.mxu2 %v309_v47  ;;  %476 = vmatpush.msra.mxu3 %v309_v47 }
  0x8b   :  { %175 = vmatmul.f32.gmra.mxu0 %v101_v42 }
  0xb0   :  { %v143_v49 = vpop.f32.mrf.mxu0 }
  0xb1   :  { %v144_v50 = vadd.f32 %v754_v48, %v143_v49  ;;  %v308_v49 = vld [vmem:[#allocation8] sm:$0xff] }
  0xb2   :  { %343 = vmatpush.msra.mxu2 %v308_v49  ;;  %477 = vmatpush.msra.mxu3 %v308_v49 }
  0xb3   :  { %488 = vtanh.f32 %v144_v50 }
  0xb6   :  { %v179_v60 = vpop.f32.mrf.mxu3 }
  0xb7   :  { %v180_v61 = vadd.f32 %v754_v48, %v179_v60 }
  0xb8   :  { %v146_v51 = vpop.f32.mrf.mxu0 }
  0xb9   :  { %v489_v52 = vpop.eup %488  ;;  %v147_v53 = vadd.f32 %v754_v48, %v146_v51 }
  0xba   :  { %243 = vmatmul.f32.vlgmr.msra.gmra.mxu1 %v489_v52 }
  0xbb   :  { %490 = vtanh.f32 %v147_v53 }
  0xbe   :  { %v182_v1 = vpop.f32.mrf.mxu3 }
  0xbf   :  { %v183_v3 = vadd.f32 %v754_v48, %v182_v1 }
  0xc0   :  { %v149_v54 = vpop.f32.mrf.mxu0 }
  0xc1   :  { %v491_v55 = vpop.eup %490  ;;  %v150_v56 = vadd.f32 %v754_v48, %v149_v54 }
  0xc2   :  { %246 = vmatmul.f32.gmra.mxu1 %v491_v55 }
  0xc3   :  { %492 = vtanh.f32 %v150_v56 }
  0xc6   :  { %v185_v7 = vpop.f32.mrf.mxu3 }
  0xc7   :  { %v186_v9 = vadd.f32 %v754_v48, %v185_v7 }
  0xc8   :  { %v152_v57 = vpop.f32.mrf.mxu0 }
  0xc9   :  { %v493_v58 = vpop.eup %492  ;;  %v153_v59 = vadd.f32 %v754_v48, %v152_v57 }
  0xca   :  { %249 = vmatmul.f32.gmra.mxu1 %v493_v58 }
  0xcb   :  { %494 = vtanh.f32 %v153_v59 }
  0xcc   :  { %496 = vtanh.f32 %v180_v61 }
  0xce   :  { %v188_v13 = vpop.f32.mrf.mxu3 }
  0xcf   :  { %v189_v15 = vadd.f32 %v754_v48, %v188_v13 }
  0xd0   :  { %v155_v62 = vpop.f32.mrf.mxu0 }
  0xd1   :  { %v495_v63 = vpop.eup %494  ;;  %v156_v0 = vadd.f32 %v754_v48, %v155_v62 }
  0xd2   :  { %252 = vmatmul.f32.gmra.mxu1 %v495_v63  ;;  %v497_v2 = vpop.eup %496 }
  0xd3   :  { %498 = vtanh.f32 %v156_v0  ;;  %279 = vmatmul.f32.vlgmr.msrb.gmra.mxu3 %v497_v2 }
  0xd4   :  { %500 = vtanh.f32 %v183_v3 }
  0xd8   :  { %v158_v4 = vpop.f32.mrf.mxu0 }
  0xd9   :  { %v499_v5 = vpop.eup %498  ;;  %v159_v6 = vadd.f32 %v754_v48, %v158_v4 }
  0xda   :  { %255 = vmatmul.f32.gmra.mxu1 %v499_v5  ;;  %v501_v8 = vpop.eup %500 }
  0xdb   :  { %502 = vtanh.f32 %v159_v6  ;;  %282 = vmatmul.f32.gmra.mxu3 %v501_v8 }
  0xdc   :  { %504 = vtanh.f32 %v186_v9 }
  0xe0   :  { %v161_v10 = vpop.f32.mrf.mxu0 }
  0xe1   :  { %v503_v11 = vpop.eup %502  ;;  %v162_v12 = vadd.f32 %v754_v48, %v161_v10 }
  0xe2   :  { %258 = vmatmul.f32.gmra.mxu1 %v503_v11  ;;  %v505_v14 = vpop.eup %504 }
  0xe3   :  { %506 = vtanh.f32 %v162_v12  ;;  %285 = vmatmul.f32.gmra.mxu3 %v505_v14 }
  0xe4   :  { %508 = vtanh.f32 %v189_v15 }
  0xe8   :  { %v164_v16 = vpop.f32.mrf.mxu0 }
  0xe9   :  { %v507_v17 = vpop.eup %506  ;;  %v165_v18 = vadd.f32 %v754_v48, %v164_v16 }
  0xea   :  { %261 = vmatmul.f32.gmra.mxu1 %v507_v17  ;;  %v509_v19 = vpop.eup %508 }
  0xeb   :  { %510 = vtanh.f32 %v165_v18  ;;  %288 = vmatmul.f32.gmra.mxu3 %v509_v19 }
  0xf0   :  { %v167_v20 = vpop.f32.mrf.mxu0 }
  0xf1   :  { %v511_v21 = vpop.eup %510  ;;  %v168_v22 = vadd.f32 %v754_v48, %v167_v20 }
  0xf2   :  { %264 = vmatmul.f32.gmra.mxu1 %v511_v21 }
  0xf3   :  { %512 = vtanh.f32 %v168_v22 }
  0xf8   :  { %v170_v27 = vpop.f32.mrf.mxu0 }
  0xf9   :  { %v513_v29 = vpop.eup %512  ;;  %v171_v30 = vadd.f32 %v754_v48, %v170_v27 }
  0xfa   :  { %267 = vmatmul.f32.gmra.mxu1 %v513_v29 }
  0xfb   :  { %514 = vtanh.f32 %v171_v30 }
 0x100   :  { %v173_v34 = vpop.f32.mrf.mxu0 }
 0x101   :  { %v515_v36 = vpop.eup %514  ;;  %v174_v37 = vadd.f32 %v754_v48, %v173_v34  ;;  %v487_v34 = vld [vmem:[%s808_s6] ss:$0 sm:$0xff]  ;;  %s686_s6 = smov [#allocation10]  }
 0x102   :  { %270 = vmatmul.f32.gmra.mxu1 %v515_v36  ;;  %s413_s23 = sshll.u32 %s686_s6, 4  ;;  %s414_s23 = int_to_ptr.vmem [resolvable:$true] %s413_s23 }
 0x103   :  { %516 = vtanh.f32 %v174_v37 }
 0x108   :  { %v176_v40 = vpop.f32.mrf.mxu0 }
 0x109   :  { %v517_v41 = vpop.eup %516  ;;  %v177_v42 = vadd.f32 %v754_v48, %v176_v40  ;;  %v775_v48 = vld [vmem:[%s806_s4] ss:$0 sm:$0xff] }
 0x10a   :  { %273 = vmatmul.f32.gmra.mxu1 %v517_v41 }
 0x10b   :  { %518 = vtanh.f32 %v177_v42 }
 0x111   :  { %v519_v43 = vpop.eup %518 }
 0x112   :  { %276 = vmatmul.f32.gmra.mxu1 %v519_v43 }
 0x137   :  { %v244_v50 = vpop.f32.mrf.mxu1 }
 0x138   :  { %v245_v51 = vadd.f32 %v775_v48, %v244_v50 }
 0x13a   :  { %520 = vtanh.f32 %v245_v51 }
 0x13f   :  { %v247_v52 = vpop.f32.mrf.mxu1 }
 0x140   :  { %v521_v53 = vpop.eup %520  ;;  %v248_v54 = vadd.f32 %v775_v48, %v247_v52 }
 0x141   :  { %344 = vmatmul.f32.vlgmr.msra.gmra.mxu2 %v521_v53 }
 0x142   :  { %522 = vtanh.f32 %v248_v54 }
 0x147   :  { %v250_v55 = vpop.f32.mrf.mxu1 }
 0x148   :  { %v523_v56 = vpop.eup %522  ;;  %v251_v57 = vadd.f32 %v775_v48, %v250_v55 }
 0x149   :  { %347 = vmatmul.f32.gmra.mxu2 %v523_v56 }
 0x14a   :  { %524 = vtanh.f32 %v251_v57 }
 0x14f   :  { %v253_v58 = vpop.f32.mrf.mxu1 }
 0x150   :  { %v525_v59 = vpop.eup %524  ;;  %v254_v60 = vadd.f32 %v775_v48, %v253_v58 }
 0x151   :  { %350 = vmatmul.f32.gmra.mxu2 %v525_v59 }
 0x152   :  { %526 = vtanh.f32 %v254_v60 }
 0x156   :  { %v280_v62 = vpop.f32.mrf.mxu3 }
 0x157   :  { %v256_v61 = vpop.f32.mrf.mxu1  ;;  %v281_v1 = vadd.f32 %v775_v48, %v280_v62 }
 0x158   :  { %v527_v63 = vpop.eup %526  ;;  %v257_v0 = vadd.f32 %v775_v48, %v256_v61 }
 0x159   :  { %353 = vmatmul.f32.gmra.mxu2 %v527_v63 }
 0x15a   :  { %528 = vtanh.f32 %v257_v0 }
 0x15b   :  { %530 = vtanh.f32 %v281_v1 }
 0x15e   :  { %v283_v3 = vpop.f32.mrf.mxu3 }
 0x15f   :  { %v259_v2 = vpop.f32.mrf.mxu1  ;;  %v284_v6 = vadd.f32 %v775_v48, %v283_v3 }
 0x160   :  { %v529_v4 = vpop.eup %528  ;;  %v260_v5 = vadd.f32 %v775_v48, %v259_v2 }
 0x161   :  { %v531_v7 = vpop.eup %530  ;;  %356 = vmatmul.f32.gmra.mxu2 %v529_v4 }
 0x162   :  { %532 = vtanh.f32 %v260_v5  ;;  %380 = vmatmul.f32.vlgmr.msra.gmra.mxu3 %v531_v7 }
 0x163   :  { %534 = vtanh.f32 %v284_v6 }
 0x166   :  { %v286_v9 = vpop.f32.mrf.mxu3 }
 0x167   :  { %v262_v8 = vpop.f32.mrf.mxu1  ;;  %v287_v12 = vadd.f32 %v775_v48, %v286_v9 }
 0x168   :  { %v533_v10 = vpop.eup %532  ;;  %v263_v11 = vadd.f32 %v775_v48, %v262_v8 }
 0x169   :  { %v535_v13 = vpop.eup %534  ;;  %359 = vmatmul.f32.gmra.mxu2 %v533_v10 }
 0x16a   :  { %536 = vtanh.f32 %v263_v11  ;;  %383 = vmatmul.f32.gmra.mxu3 %v535_v13 }
 0x16b   :  { %538 = vtanh.f32 %v287_v12 }
 0x16e   :  { %v289_v15 = vpop.f32.mrf.mxu3 }
 0x16f   :  { %v265_v14 = vpop.f32.mrf.mxu1  ;;  %v290_v18 = vadd.f32 %v775_v48, %v289_v15 }
 0x170   :  { %v537_v16 = vpop.eup %536  ;;  %v266_v17 = vadd.f32 %v775_v48, %v265_v14 }
 0x171   :  { %v539_v19 = vpop.eup %538  ;;  %362 = vmatmul.f32.gmra.mxu2 %v537_v16 }
 0x172   :  { %540 = vtanh.f32 %v266_v17  ;;  %386 = vmatmul.f32.gmra.mxu3 %v539_v19 }
 0x173   :  { %542 = vtanh.f32 %v290_v18 }
 0x177   :  { %v268_v20 = vpop.f32.mrf.mxu1 }
 0x178   :  { %v541_v21 = vpop.eup %540  ;;  %v269_v22 = vadd.f32 %v775_v48, %v268_v20 }
 0x179   :  { %v543_v23 = vpop.eup %542  ;;  %365 = vmatmul.f32.gmra.mxu2 %v541_v21 }
 0x17a   :  { %544 = vtanh.f32 %v269_v22  ;;  %389 = vmatmul.f32.gmra.mxu3 %v543_v23 }
 0x17f   :  { %v271_v24 = vpop.f32.mrf.mxu1 }
 0x180   :  { %v545_v25 = vpop.eup %544  ;;  %v272_v26 = vadd.f32 %v775_v48, %v271_v24 }
 0x181   :  { %368 = vmatmul.f32.gmra.mxu2 %v545_v25 }
 0x182   :  { %546 = vtanh.f32 %v272_v26 }
 0x187   :  { %v274_v27 = vpop.f32.mrf.mxu1 }
 0x188   :  { %v547_v28 = vpop.eup %546  ;;  %v275_v29 = vadd.f32 %v775_v48, %v274_v27 }
 0x189   :  { %371 = vmatmul.f32.gmra.mxu2 %v547_v28 }
 0x18a   :  { %548 = vtanh.f32 %v275_v29 }
 0x18f   :  { %v277_v30 = vpop.f32.mrf.mxu1 }
 0x190   :  { %v549_v31 = vpop.eup %548  ;;  %v278_v32 = vadd.f32 %v775_v48, %v277_v30 }
 0x191   :  { %374 = vmatmul.f32.gmra.mxu2 %v549_v31 }
 0x192   :  { %550 = vtanh.f32 %v278_v32 }
 0x198   :  { %v551_v33 = vpop.eup %550 }
 0x199   :  { %377 = vmatmul.f32.gmra.mxu2 %v551_v33 }
 0x1c4   :  { %v345_v35 = vpop.f32.mrf.mxu2 }
 0x1c5   :  { %v346_v36 = vadd.f32 %v487_v34, %v345_v35 }
 0x1c7   :  { %393 = vst [vmem:[#allocation10] sm:$0xff] %v346_v36 }
 0x1cc   :  { %v348_v37 = vpop.f32.mrf.mxu2 }
 0x1cd   :  { %v349_v38 = vadd.f32 %v487_v34, %v348_v37 }
 0x1cf   :  { %394 = vst [vmem:[#allocation10 + $0x8] sm:$0xff] %v349_v38 }
 0x1d4   :  { %v351_v39 = vpop.f32.mrf.mxu2 }
 0x1d5   :  { %v352_v40 = vadd.f32 %v487_v34, %v351_v39 }
 0x1d7   :  { %395 = vst [vmem:[#allocation10 + $0x10] sm:$0xff] %v352_v40 }
 0x1dc   :  { %v354_v41 = vpop.f32.mrf.mxu2 }
 0x1dd   :  { %v355_v42 = vadd.f32 %v487_v34, %v354_v41 }
 0x1df   :  { %396 = vst [vmem:[#allocation10 + $0x18] sm:$0xff] %v355_v42 }
 0x1e4   :  { %v357_v43 = vpop.f32.mrf.mxu2 }
 0x1e5   :  { %v358_v44 = vadd.f32 %v487_v34, %v357_v43  ;;  %v381_v45 = vpop.f32.mrf.mxu3 }
 0x1e6   :  { %v382_v46 = vadd.f32 %v487_v34, %v381_v45 }
 0x1e7   :  { %397 = vst [vmem:[#allocation10 + $0x20] sm:$0xff] %v358_v44 }
 0x1e8   :  { %405 = vst [vmem:[#allocation10 + $0x60] sm:$0xff] %v382_v46 }
 0x1ec   :  { %v360_v47 = vpop.f32.mrf.mxu2 }
 0x1ed   :  { %v361_v49 = vadd.f32 %v487_v34, %v360_v47  ;;  %v384_v48 = vpop.f32.mrf.mxu3 }
 0x1ee   :  { %v385_v50 = vadd.f32 %v487_v34, %v384_v48 }
 0x1ef   :  { %398 = vst [vmem:[#allocation10 + $0x28] sm:$0xff] %v361_v49 }
 0x1f0   :  { %406 = vst [vmem:[#allocation10 + $0x68] sm:$0xff] %v385_v50 }
 0x1f4   :  { %v363_v51 = vpop.f32.mrf.mxu2 }
 0x1f5   :  { %v364_v52 = vadd.f32 %v487_v34, %v363_v51  ;;  %v387_v53 = vpop.f32.mrf.mxu3 }
 0x1f6   :  { %v388_v54 = vadd.f32 %v487_v34, %v387_v53 }
 0x1f7   :  { %399 = vst [vmem:[#allocation10 + $0x30] sm:$0xff] %v364_v52 }
 0x1f8   :  { %407 = vst [vmem:[#allocation10 + $0x70] sm:$0xff] %v388_v54 }
 0x1fc   :  { %v366_v55 = vpop.f32.mrf.mxu2 }
 0x1fd   :  { %v367_v56 = vadd.f32 %v487_v34, %v366_v55  ;;  %v390_v57 = vpop.f32.mrf.mxu3 }
 0x1fe   :  { %v391_v58 = vadd.f32 %v487_v34, %v390_v57 }
 0x1ff   :  { %400 = vst [vmem:[#allocation10 + $0x38] sm:$0xff] %v367_v56 }
 0x200   :  { %408 = vst [vmem:[#allocation10 + $0x78] sm:$0xff] %v391_v58 }
 0x204   :  { %v369_v59 = vpop.f32.mrf.mxu2 }
 0x205   :  { %v370_v60 = vadd.f32 %v487_v34, %v369_v59 }
 0x207   :  { %401 = vst [vmem:[#allocation10 + $0x40] sm:$0xff] %v370_v60 }
 0x20c   :  { %v372_v61 = vpop.f32.mrf.mxu2 }
 0x20d   :  { %v373_v62 = vadd.f32 %v487_v34, %v372_v61 }
 0x20f   :  { %402 = vst [vmem:[#allocation10 + $0x48] sm:$0xff] %v373_v62 }
 0x214   :  { %v375_v63 = vpop.f32.mrf.mxu2 }
 0x215   :  { %v376_v0 = vadd.f32 %v487_v34, %v375_v63 }
 0x217   :  { %403 = vst [vmem:[#allocation10 + $0x50] sm:$0xff] %v376_v0 }
 0x21c   :  { %v378_v1 = vpop.f32.mrf.mxu2 }
 0x21d   :  { %v379_v2 = vadd.f32 %v487_v34, %v378_v1 }
 0x21f   :  { %404 = vst [vmem:[#allocation10 + $0x58] sm:$0xff] %v379_v2 }
 0x220   :  { %421 = dma.vmem_to_hbm [thread:$0]  %s414_s23, 2048, %s416_s26, [#allocation4], %s681_s9, %s681_s9, %s682_s10  }
 0x221   :  { %678 = dma.done.wait [#allocation4], 2048  }
 0x222   :  { %679 = vsyncadd [#allocation4], 4294965248 }
 0x223   :  { %426 = vsyncpa [#allocation3], 1 }
 0x224   :  { %427 = vsyncpa [#allocation6], 1 }
 0x225   :  { %428 = vsyncpa [#allocation9], 1 }
 0x226   :  { %429 = vsyncpa [#allocation4], 1 }

</bundles_post_ra>
